<compile_context>
chip_gen: v7x
topology: tpu7x:2x2x1
jax: 0.10.0
libtpu: 0.0.40
codegen_flags: <defaults>
</compile_context>

<pallas_src>
import functools

import jax
import jax.numpy as jnp
from jax import lax
from jax.experimental import pallas as pl
from jax.experimental.pallas import tpu as pltpu

VOCAB_SIZE = 20
EMBED_DIM = 32
HIDDEN_DIM = 64          # matches HIDDEN_DIM in the PyTorch file
NUM_LAYERS = 2


def _lstm_kernel(x_ref, h0_ref, c0_ref,
                 whh0_ref, w1_ref, b1_ref,
                 fcw_ref, fcb_ref,
                 out_ref, hT_ref, cT_ref,
                 h1buf,
                 *, T, Bp, H):
    """Single program: runs all T timesteps of the 2-layer LSTM, then one FC."""

    def gates_to_hc(g, c_prev):
        # Gate columns are stored as [i, f, o, g]: one contiguous sigmoid over
        # the first 3H columns, one tanh over the trailing H columns.
        sg = jax.nn.sigmoid(g[:, :3 * H])
        i = sg[:, 0:H]
        f = sg[:, H:2 * H]
        o = sg[:, 2 * H:3 * H]
        gg = jnp.tanh(g[:, 3 * H:4 * H])
        c_new = f * c_prev + i * gg
        h_new = o * jnp.tanh(c_new)
        return h_new, c_new

    # Recurrent state lives in vector registers for the whole sequence.
    h0 = h0_ref[0]
    h1 = h0_ref[1]
    c0 = c0_ref[0]
    c1 = c0_ref[1]

    # Only the tiny (1, 4H) bias is hoisted; weight matrices are loaded at
    # their dot sites so they don't pin vregs across the unrolled loop.
    b1 = b1_ref[...]

    for t in range(T):  # fully unrolled: T is a small trace-time constant
        # Layer 0: the input projection (x_t @ W_ih0 + b0) was folded into the
        # embedding gather in the wrapper, so only the recurrent matmul remains
        # on the serial critical path.
        g0 = x_ref[t] + jnp.dot(h0, whh0_ref[...],
                                preferred_element_type=jnp.float32)
        h0, c0 = gates_to_hc(g0, c0)

        # Layer 1: single fused K=2H matmul over [h0_new, h1_prev] against the
        # pre-stacked [W_ih1; W_hh1] weight (one full MXU push instead of two
        # half-filled ones).
        hcat = jnp.concatenate([h0, h1], axis=1)            # (Bp, 2H)
        g1 = jnp.dot(hcat, w1_ref[...],
                     preferred_element_type=jnp.float32) + b1
        h1, c1 = gates_to_hc(g1, c1)

        # Stash h1_t; the FC projection is done once, after the loop.
        h1buf[pl.ds(t * Bp, Bp), :] = h1

    # Final (h, c) state outputs.
    hT_ref[0] = h0
    hT_ref[1] = h1
    cT_ref[0] = c0
    cT_ref[1] = c1

    # One batched FC matmul over all T*Bp rows + one unmasked lane-dense store.
    out_ref[...] = (jnp.dot(h1buf[...], fcw_ref[...],
                            preferred_element_type=jnp.float32)
                    + fcb_ref[...])


def diminutive_generator_forward(x_tokens, hidden, params):
    """x_tokens: (B, T) int32 ids in [0, vocab_size]; hidden = (h0, c0) each (2, B, H)."""
    h0c, c0c = hidden
    B, T = x_tokens.shape
    H = params["whh0"].shape[0]
    G = 4 * H
    V1 = params["embedding"].shape[0]       # vocab_size + 1
    VPAD = params["fcw_pad"].shape[1]       # padded (lane-dense) output width
    Bp = max(8, pl.cdiv(B, 8) * 8)          # pad batch to full sublane width

    # Gather pre-projected embedding rows (table precomputed in init_params),
    # time-major.  (E @ W)[ids] == (E[ids]) @ W, so this is mathematically
    # identical to embedding -> input projection.
    ids_tm = jnp.transpose(x_tokens).reshape(-1)                       # (T*B,)
    xproj = jnp.take(params["tab"], ids_tm, axis=0).reshape(T, B, G)   # (T, B, 4H)

    if Bp != B:
        pad = [(0, 0), (0, Bp - B), (0, 0)]
        xproj = jnp.pad(xproj, pad)
        h0c = jnp.pad(h0c, pad)
        c0c = jnp.pad(c0c, pad)

    kernel = functools.partial(_lstm_kernel, T=T, Bp=Bp, H=H)
    out_flat, hT, cT = pl.pallas_call(
        kernel,
        out_shape=(
            jax.ShapeDtypeStruct((T * Bp, VPAD), jnp.float32),
            jax.ShapeDtypeStruct((NUM_LAYERS, Bp, H), jnp.float32),
            jax.ShapeDtypeStruct((NUM_LAYERS, Bp, H), jnp.float32),
        ),
        grid=(1,),
        in_specs=[
            pl.BlockSpec((T, Bp, G), lambda i: (0, 0, 0)),             # xproj
            pl.BlockSpec((NUM_LAYERS, Bp, H), lambda i: (0, 0, 0)),    # h0
            pl.BlockSpec((NUM_LAYERS, Bp, H), lambda i: (0, 0, 0)),    # c0
            pl.BlockSpec((H, G), lambda i: (0, 0)),                    # W_hh layer0
            pl.BlockSpec((2 * H, G), lambda i: (0, 0)),                # [W_ih1; W_hh1]
            pl.BlockSpec((1, G), lambda i: (0, 0)),                    # bias layer1
            pl.BlockSpec((H, VPAD), lambda i: (0, 0)),                 # fc weight (padded)
            pl.BlockSpec((1, VPAD), lambda i: (0, 0)),                 # fc bias (padded)
        ],
        out_specs=(
            pl.BlockSpec((T * Bp, VPAD), lambda i: (0, 0)),
            pl.BlockSpec((NUM_LAYERS, Bp, H), lambda i: (0, 0, 0)),
            pl.BlockSpec((NUM_LAYERS, Bp, H), lambda i: (0, 0, 0)),
        ),
        scratch_shapes=[pltpu.VMEM((T * Bp, H), jnp.float32)],         # h1 stash
        compiler_params=pltpu.CompilerParams(
            dimension_semantics=("arbitrary",)),
    )(xproj, h0c, c0c,
      params["whh0"], params["w1_stacked"], params["b1"],
      params["fcw_pad"], params["fcb_pad"])

    # (T*Bp, VPAD) -> (T, Bp, VPAD) -> batch-first (B, T, V1)
    out = out_flat.reshape(T, Bp, VPAD)[:, :B, :V1].transpose(1, 0, 2)
    return out, (hT[:, :B], cT[:, :B])


def init_params(key, vocab_size, embed_dim, hidden_dim):
    V1 = vocab_size + 1
    VPAD = pl.cdiv(V1, 128) * 128            # lane-dense output width
    ks = jax.random.split(key, 10)
    scale = 0.1
    emb = scale * jax.random.normal(ks[0], (V1, embed_dim), jnp.float32)
    emb = emb.at[vocab_size].set(0.0)        # padding_idx row = 0
    fcw = scale * jax.random.normal(ks[7], (hidden_dim, V1), jnp.float32)
    fcb = scale * jax.random.normal(ks[8], (1, V1), jnp.float32)

    # LSTM weights stored pre-transposed (in_features, 4H); gate column order
    # is [i, f, o, g]; biases are b_ih + b_hh folded together.
    wih0 = scale * jax.random.normal(ks[1], (embed_dim, 4 * hidden_dim), jnp.float32)
    whh0 = scale * jax.random.normal(ks[2], (hidden_dim, 4 * hidden_dim), jnp.float32)
    b0 = scale * jax.random.normal(ks[3], (1, 4 * hidden_dim), jnp.float32)
    wih1 = scale * jax.random.normal(ks[4], (hidden_dim, 4 * hidden_dim), jnp.float32)
    whh1 = scale * jax.random.normal(ks[5], (hidden_dim, 4 * hidden_dim), jnp.float32)
    b1 = scale * jax.random.normal(ks[6], (1, 4 * hidden_dim), jnp.float32)

    params = {
        "embedding": emb,
        "wih0": wih0, "whh0": whh0, "b0": b0,
        "wih1": wih1, "whh1": whh1, "b1": b1,
        # Pre-projected embedding table: row v = embedding[v] @ W_ih0 + b0.
        # Note the padding_idx row equals b0 (bias applies to pad tokens too).
        "tab": jnp.dot(emb, wih0) + b0,
        # Stacked layer-1 weight so the kernel does one K=2H matmul per step.
        "w1_stacked": jnp.concatenate([wih1, whh1], axis=0),   # (2H, 4H)
        # FC padded out to a full 128-lane width (extra columns are zero and
        # are sliced off in the wrapper) so the kernel's output store is
        # lane-dense rather than a masked 21-wide partial store.
        "fcw_pad": jnp.zeros((hidden_dim, VPAD), jnp.float32).at[:, :V1].set(fcw),
        "fcb_pad": jnp.zeros((1, VPAD), jnp.float32).at[:, :V1].set(fcb),
    }
    return params


def reference_forward(x_tokens, hidden, params):
    """Pure-JAX reference (lax.scan) matching PyTorch LSTM semantics."""
    h0, c0 = hidden
    H = params["whh0"].shape[0]
    V1 = params["embedding"].shape[0]
    emb = jnp.take(params["embedding"], x_tokens, axis=0)    # (B, T, E)
    emb_tm = jnp.transpose(emb, (1, 0, 2))                   # (T, B, E)

    def gates_to_hc(g, c_prev):
        i = jax.nn.sigmoid(g[:, 0:H])
        f = jax.nn.sigmoid(g[:, H:2 * H])
        o = jax.nn.sigmoid(g[:, 2 * H:3 * H])
        gg = jnp.tanh(g[:, 3 * H:4 * H])
        c = f * c_prev + i * gg
        h = o * jnp.tanh(c)
        return h, c

    def step(carry, x_t):
        (h0_, c0_), (h1_, c1_) = carry
        g0 = x_t @ params["wih0"] + params["b0"] + h0_ @ params["whh0"]
        h0n, c0n = gates_to_hc(g0, c0_)
        g1 = h0n @ params["wih1"] + h1_ @ params["whh1"] + params["b1"]
        h1n, c1n = gates_to_hc(g1, c1_)
        out_t = (h1n @ params["fcw_pad"] + params["fcb_pad"])[:, :V1]
        return ((h0n, c0n), (h1n, c1n)), out_t

    carry0 = ((h0[0], c0[0]), (h0[1], c0[1]))
    carryT, out_tm = lax.scan(step, carry0, emb_tm)
    (h0f, c0f), (h1f, c1f) = carryT
    out = jnp.transpose(out_tm, (1, 0, 2))
    hT = jnp.stack([h0f, h1f])
    cT = jnp.stack([c0f, c1f])
    return out, (hT, cT)


if __name__ == "__main__":
    key = jax.random.PRNGKey(0)
    pkey, xkey = jax.random.split(key)

    batch, seq = 2, 8
    params = init_params(pkey, VOCAB_SIZE, EMBED_DIM, HIDDEN_DIM)

    x = jax.random.randint(xkey, (batch, seq), 0, VOCAB_SIZE + 1, dtype=jnp.int32)
    hidden = (jnp.zeros((NUM_LAYERS, batch, HIDDEN_DIM), jnp.float32),
              jnp.zeros((NUM_LAYERS, batch, HIDDEN_DIM), jnp.float32))

    out, (hT, cT) = jax.jit(functools.partial(diminutive_generator_forward,
                                              params=params))(x, hidden)
    jax.block_until_ready((out, hT, cT))

    ref_out, (ref_hT, ref_cT) = reference_forward(x, hidden, params)
    assert out.shape == (batch, seq, VOCAB_SIZE + 1)
    assert hT.shape == (NUM_LAYERS, batch, HIDDEN_DIM)
    assert cT.shape == (NUM_LAYERS, batch, HIDDEN_DIM)
    assert jnp.allclose(out, ref_out, rtol=1e-2, atol=1e-2)
    assert jnp.allclose(hT, ref_hT, rtol=1e-2, atol=1e-2)
    assert jnp.allclose(cT, ref_cT, rtol=1e-2, atol=1e-2)

    print("KERNEL_OK")
</pallas_src>

<mosaic_0001>
module attributes {stable_mosaic.version = 11 : i64} {
  func.func @_lstm_kernel(%arg0: i32, %arg1: memref<8x8x256xf32, #tpu.memory_space<vmem>>, %arg2: memref<2x8x64xf32, #tpu.memory_space<vmem>>, %arg3: memref<2x8x64xf32, #tpu.memory_space<vmem>>, %arg4: memref<64x256xf32, #tpu.memory_space<vmem>>, %arg5: memref<128x256xf32, #tpu.memory_space<vmem>>, %arg6: memref<1x256xf32, #tpu.memory_space<vmem>>, %arg7: memref<64x128xf32, #tpu.memory_space<vmem>>, %arg8: memref<1x128xf32, #tpu.memory_space<vmem>>, %arg9: memref<64x128xf32, #tpu.memory_space<vmem>>, %arg10: memref<2x8x64xf32, #tpu.memory_space<vmem>>, %arg11: memref<2x8x64xf32, #tpu.memory_space<vmem>>, %arg12: memref<64x64xf32, #tpu.memory_space<vmem>>) attributes {dimension_semantics = [#tpu.dimension_semantics<arbitrary>], iteration_bounds = array<i64: 1>, scalar_prefetch = 0 : i64, scratch_operands = 1 : i64, tpu.core_type = #tpu.core_type<tc>, window_params = [{pipeline_mode = #tpu.pipeline_mode<synchronous>, transform_indices = @transform_0, window_bounds = array<i64: 8, 8, 256>}, {pipeline_mode = #tpu.pipeline_mode<synchronous>, transform_indices = @transform_1, window_bounds = array<i64: 2, 8, 64>}, {pipeline_mode = #tpu.pipeline_mode<synchronous>, transform_indices = @transform_2, window_bounds = array<i64: 2, 8, 64>}, {pipeline_mode = #tpu.pipeline_mode<synchronous>, transform_indices = @transform_3, window_bounds = array<i64: 64, 256>}, {pipeline_mode = #tpu.pipeline_mode<synchronous>, transform_indices = @transform_4, window_bounds = array<i64: 128, 256>}, {pipeline_mode = #tpu.pipeline_mode<synchronous>, transform_indices = @transform_5, window_bounds = array<i64: 1, 256>}, {pipeline_mode = #tpu.pipeline_mode<synchronous>, transform_indices = @transform_6, window_bounds = array<i64: 64, 128>}, {pipeline_mode = #tpu.pipeline_mode<synchronous>, transform_indices = @transform_7, window_bounds = array<i64: 1, 128>}, {pipeline_mode = #tpu.pipeline_mode<synchronous>, transform_indices = @transform_8, window_bounds = array<i64: 64, 128>}, {pipeline_mode = #tpu.pipeline_mode<synchronous>, transform_indices = @transform_9, window_bounds = array<i64: 2, 8, 64>}, {pipeline_mode = #tpu.pipeline_mode<synchronous>, transform_indices = @transform_10, window_bounds = array<i64: 2, 8, 64>}]} {
    %c0 = arith.constant 0 : index
    %c0_0 = arith.constant 0 : index
    %c0_1 = arith.constant 0 : index
    %0 = vector.load %arg2[%c0, %c0_0, %c0_1] : memref<2x8x64xf32, #tpu.memory_space<vmem>>, vector<1x8x64xf32>
    %1 = vector.shape_cast %0 : vector<1x8x64xf32> to vector<8x64xf32>
    %c1 = arith.constant 1 : index
    %c0_2 = arith.constant 0 : index
    %c0_3 = arith.constant 0 : index
    %2 = vector.load %arg2[%c1, %c0_2, %c0_3] : memref<2x8x64xf32, #tpu.memory_space<vmem>>, vector<1x8x64xf32>
    %3 = vector.shape_cast %2 : vector<1x8x64xf32> to vector<8x64xf32>
    %c0_4 = arith.constant 0 : index
    %c0_5 = arith.constant 0 : index
    %c0_6 = arith.constant 0 : index
    %4 = vector.load %arg3[%c0_4, %c0_5, %c0_6] : memref<2x8x64xf32, #tpu.memory_space<vmem>>, vector<1x8x64xf32>
    %5 = vector.shape_cast %4 : vector<1x8x64xf32> to vector<8x64xf32>
    %c1_7 = arith.constant 1 : index
    %c0_8 = arith.constant 0 : index
    %c0_9 = arith.constant 0 : index
    %6 = vector.load %arg3[%c1_7, %c0_8, %c0_9] : memref<2x8x64xf32, #tpu.memory_space<vmem>>, vector<1x8x64xf32>
    %7 = vector.shape_cast %6 : vector<1x8x64xf32> to vector<8x64xf32>
    %c0_10 = arith.constant 0 : index
    %c0_11 = arith.constant 0 : index
    %8 = vector.load %arg6[%c0_10, %c0_11] : memref<1x256xf32, #tpu.memory_space<vmem>>, vector<1x256xf32>
    %c0_12 = arith.constant 0 : index
    %c0_13 = arith.constant 0 : index
    %c0_14 = arith.constant 0 : index
    %9 = vector.load %arg1[%c0_12, %c0_13, %c0_14] : memref<8x8x256xf32, #tpu.memory_space<vmem>>, vector<1x8x256xf32>
    %10 = vector.shape_cast %9 : vector<1x8x256xf32> to vector<8x256xf32>
    %c0_15 = arith.constant 0 : index
    %c0_16 = arith.constant 0 : index
    %11 = vector.load %arg4[%c0_15, %c0_16] : memref<64x256xf32, #tpu.memory_space<vmem>>, vector<64x256xf32>
    %cst = arith.constant dense<0.000000e+00> : vector<8x256xf32>
    %12 = tpu.matmul %1, %11, %cst {dimension_numbers = #tpu.dot_dimension_numbers<[1], [0], [0], [1], [0, 0, 1, 1], [], []>} : vector<8x64xf32>, vector<64x256xf32>, vector<8x256xf32> -> vector<8x256xf32>
    %13 = arith.addf %10, %12 : vector<8x256xf32>
    %14 = vector.extract_strided_slice %13 {offsets = [0, 0], sizes = [8, 192], strides = [1, 1]} : vector<8x256xf32> to vector<8x192xf32>
    %15 = arith.negf %14 : vector<8x192xf32>
    %16 = math.exp %15 : vector<8x192xf32>
    %cst_17 = arith.constant 1.000000e+00 : f32
    %17 = vector.broadcast %cst_17 : f32 to vector<8x192xf32>
    %18 = arith.addf %17, %16 : vector<8x192xf32>
    %19 = arith.divf %17, %18 : vector<8x192xf32>
    %20 = vector.extract_strided_slice %19 {offsets = [0, 0], sizes = [8, 64], strides = [1, 1]} : vector<8x192xf32> to vector<8x64xf32>
    %21 = vector.extract_strided_slice %19 {offsets = [0, 64], sizes = [8, 64], strides = [1, 1]} : vector<8x192xf32> to vector<8x64xf32>
    %22 = vector.extract_strided_slice %19 {offsets = [0, 128], sizes = [8, 64], strides = [1, 1]} : vector<8x192xf32> to vector<8x64xf32>
    %23 = vector.extract_strided_slice %13 {offsets = [0, 192], sizes = [8, 64], strides = [1, 1]} : vector<8x256xf32> to vector<8x64xf32>
    %24 = math.tanh %23 : vector<8x64xf32>
    %25 = arith.mulf %21, %5 : vector<8x64xf32>
    %26 = arith.mulf %20, %24 : vector<8x64xf32>
    %27 = arith.addf %25, %26 : vector<8x64xf32>
    %28 = math.tanh %27 : vector<8x64xf32>
    %29 = arith.mulf %22, %28 : vector<8x64xf32>
    %30 = tpu.concatenate %29, %3 in 1 : vector<8x64xf32>, vector<8x64xf32> -> vector<8x128xf32>
    %c0_18 = arith.constant 0 : index
    %c0_19 = arith.constant 0 : index
    %31 = vector.load %arg5[%c0_18, %c0_19] : memref<128x256xf32, #tpu.memory_space<vmem>>, vector<128x256xf32>
    %cst_20 = arith.constant dense<0.000000e+00> : vector<8x256xf32>
    %32 = tpu.matmul %30, %31, %cst_20 {dimension_numbers = #tpu.dot_dimension_numbers<[1], [0], [0], [1], [0, 0, 1, 1], [], []>} : vector<8x128xf32>, vector<128x256xf32>, vector<8x256xf32> -> vector<8x256xf32>
    %33 = vector.broadcast %8 : vector<1x256xf32> to vector<8x256xf32>
    %34 = arith.addf %32, %33 : vector<8x256xf32>
    %35 = vector.extract_strided_slice %34 {offsets = [0, 0], sizes = [8, 192], strides = [1, 1]} : vector<8x256xf32> to vector<8x192xf32>
    %36 = arith.negf %35 : vector<8x192xf32>
    %37 = math.exp %36 : vector<8x192xf32>
    %cst_21 = arith.constant 1.000000e+00 : f32
    %38 = vector.broadcast %cst_21 : f32 to vector<8x192xf32>
    %39 = arith.addf %38, %37 : vector<8x192xf32>
    %40 = arith.divf %38, %39 : vector<8x192xf32>
    %41 = vector.extract_strided_slice %40 {offsets = [0, 0], sizes = [8, 64], strides = [1, 1]} : vector<8x192xf32> to vector<8x64xf32>
    %42 = vector.extract_strided_slice %40 {offsets = [0, 64], sizes = [8, 64], strides = [1, 1]} : vector<8x192xf32> to vector<8x64xf32>
    %43 = vector.extract_strided_slice %40 {offsets = [0, 128], sizes = [8, 64], strides = [1, 1]} : vector<8x192xf32> to vector<8x64xf32>
    %44 = vector.extract_strided_slice %34 {offsets = [0, 192], sizes = [8, 64], strides = [1, 1]} : vector<8x256xf32> to vector<8x64xf32>
    %45 = math.tanh %44 : vector<8x64xf32>
    %46 = arith.mulf %42, %7 : vector<8x64xf32>
    %47 = arith.mulf %41, %45 : vector<8x64xf32>
    %48 = arith.addf %46, %47 : vector<8x64xf32>
    %49 = math.tanh %48 : vector<8x64xf32>
    %50 = arith.mulf %43, %49 : vector<8x64xf32>
    %c0_22 = arith.constant 0 : index
    %c0_23 = arith.constant 0 : index
    %51 = vector.load %arg12[%c0_22, %c0_23] : memref<64x64xf32, #tpu.memory_space<vmem>>, vector<8x64xf32>
    tpu.vector_store %arg12[%c0_22, %c0_23], %50 {strides = array<i32>} : memref<64x64xf32, #tpu.memory_space<vmem>>, vector<8x64xf32>,
    %c1_24 = arith.constant 1 : index
    %c0_25 = arith.constant 0 : index
    %c0_26 = arith.constant 0 : index
    %52 = vector.load %arg1[%c1_24, %c0_25, %c0_26] : memref<8x8x256xf32, #tpu.memory_space<vmem>>, vector<1x8x256xf32>
    %53 = vector.shape_cast %52 : vector<1x8x256xf32> to vector<8x256xf32>
    %c0_27 = arith.constant 0 : index
    %c0_28 = arith.constant 0 : index
    %54 = vector.load %arg4[%c0_27, %c0_28] : memref<64x256xf32, #tpu.memory_space<vmem>>, vector<64x256xf32>
    %cst_29 = arith.constant dense<0.000000e+00> : vector<8x256xf32>
    %55 = tpu.matmul %29, %54, %cst_29 {dimension_numbers = #tpu.dot_dimension_numbers<[1], [0], [0], [1], [0, 0, 1, 1], [], []>} : vector<8x64xf32>, vector<64x256xf32>, vector<8x256xf32> -> vector<8x256xf32>
    %56 = arith.addf %53, %55 : vector<8x256xf32>
    %57 = vector.extract_strided_slice %56 {offsets = [0, 0], sizes = [8, 192], strides = [1, 1]} : vector<8x256xf32> to vector<8x192xf32>
    %58 = arith.negf %57 : vector<8x192xf32>
    %59 = math.exp %58 : vector<8x192xf32>
    %cst_30 = arith.constant 1.000000e+00 : f32
    %60 = vector.broadcast %cst_30 : f32 to vector<8x192xf32>
    %61 = arith.addf %60, %59 : vector<8x192xf32>
    %62 = arith.divf %60, %61 : vector<8x192xf32>
    %63 = vector.extract_strided_slice %62 {offsets = [0, 0], sizes = [8, 64], strides = [1, 1]} : vector<8x192xf32> to vector<8x64xf32>
    %64 = vector.extract_strided_slice %62 {offsets = [0, 64], sizes = [8, 64], strides = [1, 1]} : vector<8x192xf32> to vector<8x64xf32>
    %65 = vector.extract_strided_slice %62 {offsets = [0, 128], sizes = [8, 64], strides = [1, 1]} : vector<8x192xf32> to vector<8x64xf32>
    %66 = vector.extract_strided_slice %56 {offsets = [0, 192], sizes = [8, 64], strides = [1, 1]} : vector<8x256xf32> to vector<8x64xf32>
    %67 = math.tanh %66 : vector<8x64xf32>
    %68 = arith.mulf %64, %27 : vector<8x64xf32>
    %69 = arith.mulf %63, %67 : vector<8x64xf32>
    %70 = arith.addf %68, %69 : vector<8x64xf32>
    %71 = math.tanh %70 : vector<8x64xf32>
    %72 = arith.mulf %65, %71 : vector<8x64xf32>
    %73 = tpu.concatenate %72, %50 in 1 : vector<8x64xf32>, vector<8x64xf32> -> vector<8x128xf32>
    %c0_31 = arith.constant 0 : index
    %c0_32 = arith.constant 0 : index
    %74 = vector.load %arg5[%c0_31, %c0_32] : memref<128x256xf32, #tpu.memory_space<vmem>>, vector<128x256xf32>
    %cst_33 = arith.constant dense<0.000000e+00> : vector<8x256xf32>
    %75 = tpu.matmul %73, %74, %cst_33 {dimension_numbers = #tpu.dot_dimension_numbers<[1], [0], [0], [1], [0, 0, 1, 1], [], []>} : vector<8x128xf32>, vector<128x256xf32>, vector<8x256xf32> -> vector<8x256xf32>
    %76 = vector.broadcast %8 : vector<1x256xf32> to vector<8x256xf32>
    %77 = arith.addf %75, %76 : vector<8x256xf32>
    %78 = vector.extract_strided_slice %77 {offsets = [0, 0], sizes = [8, 192], strides = [1, 1]} : vector<8x256xf32> to vector<8x192xf32>
    %79 = arith.negf %78 : vector<8x192xf32>
    %80 = math.exp %79 : vector<8x192xf32>
    %cst_34 = arith.constant 1.000000e+00 : f32
    %81 = vector.broadcast %cst_34 : f32 to vector<8x192xf32>
    %82 = arith.addf %81, %80 : vector<8x192xf32>
    %83 = arith.divf %81, %82 : vector<8x192xf32>
    %84 = vector.extract_strided_slice %83 {offsets = [0, 0], sizes = [8, 64], strides = [1, 1]} : vector<8x192xf32> to vector<8x64xf32>
    %85 = vector.extract_strided_slice %83 {offsets = [0, 64], sizes = [8, 64], strides = [1, 1]} : vector<8x192xf32> to vector<8x64xf32>
    %86 = vector.extract_strided_slice %83 {offsets = [0, 128], sizes = [8, 64], strides = [1, 1]} : vector<8x192xf32> to vector<8x64xf32>
    %87 = vector.extract_strided_slice %77 {offsets = [0, 192], sizes = [8, 64], strides = [1, 1]} : vector<8x256xf32> to vector<8x64xf32>
    %88 = math.tanh %87 : vector<8x64xf32>
    %89 = arith.mulf %85, %48 : vector<8x64xf32>
    %90 = arith.mulf %84, %88 : vector<8x64xf32>
    %91 = arith.addf %89, %90 : vector<8x64xf32>
    %92 = math.tanh %91 : vector<8x64xf32>
    %93 = arith.mulf %86, %92 : vector<8x64xf32>
    %c8 = arith.constant 8 : index
    %c0_35 = arith.constant 0 : index
    %94 = vector.load %arg12[%c8, %c0_35] : memref<64x64xf32, #tpu.memory_space<vmem>>, vector<8x64xf32>
    tpu.vector_store %arg12[%c8, %c0_35], %93 {strides = array<i32>} : memref<64x64xf32, #tpu.memory_space<vmem>>, vector<8x64xf32>,
    %c2 = arith.constant 2 : index
    %c0_36 = arith.constant 0 : index
    %c0_37 = arith.constant 0 : index
    %95 = vector.load %arg1[%c2, %c0_36, %c0_37] : memref<8x8x256xf32, #tpu.memory_space<vmem>>, vector<1x8x256xf32>
    %96 = vector.shape_cast %95 : vector<1x8x256xf32> to vector<8x256xf32>
    %c0_38 = arith.constant 0 : index
    %c0_39 = arith.constant 0 : index
    %97 = vector.load %arg4[%c0_38, %c0_39] : memref<64x256xf32, #tpu.memory_space<vmem>>, vector<64x256xf32>
    %cst_40 = arith.constant dense<0.000000e+00> : vector<8x256xf32>
    %98 = tpu.matmul %72, %97, %cst_40 {dimension_numbers = #tpu.dot_dimension_numbers<[1], [0], [0], [1], [0, 0, 1, 1], [], []>} : vector<8x64xf32>, vector<64x256xf32>, vector<8x256xf32> -> vector<8x256xf32>
    %99 = arith.addf %96, %98 : vector<8x256xf32>
    %100 = vector.extract_strided_slice %99 {offsets = [0, 0], sizes = [8, 192], strides = [1, 1]} : vector<8x256xf32> to vector<8x192xf32>
    %101 = arith.negf %100 : vector<8x192xf32>
    %102 = math.exp %101 : vector<8x192xf32>
    %cst_41 = arith.constant 1.000000e+00 : f32
    %103 = vector.broadcast %cst_41 : f32 to vector<8x192xf32>
    %104 = arith.addf %103, %102 : vector<8x192xf32>
    %105 = arith.divf %103, %104 : vector<8x192xf32>
    %106 = vector.extract_strided_slice %105 {offsets = [0, 0], sizes = [8, 64], strides = [1, 1]} : vector<8x192xf32> to vector<8x64xf32>
    %107 = vector.extract_strided_slice %105 {offsets = [0, 64], sizes = [8, 64], strides = [1, 1]} : vector<8x192xf32> to vector<8x64xf32>
    %108 = vector.extract_strided_slice %105 {offsets = [0, 128], sizes = [8, 64], strides = [1, 1]} : vector<8x192xf32> to vector<8x64xf32>
    %109 = vector.extract_strided_slice %99 {offsets = [0, 192], sizes = [8, 64], strides = [1, 1]} : vector<8x256xf32> to vector<8x64xf32>
    %110 = math.tanh %109 : vector<8x64xf32>
    %111 = arith.mulf %107, %70 : vector<8x64xf32>
    %112 = arith.mulf %106, %110 : vector<8x64xf32>
    %113 = arith.addf %111, %112 : vector<8x64xf32>
    %114 = math.tanh %113 : vector<8x64xf32>
    %115 = arith.mulf %108, %114 : vector<8x64xf32>
    %116 = tpu.concatenate %115, %93 in 1 : vector<8x64xf32>, vector<8x64xf32> -> vector<8x128xf32>
    %c0_42 = arith.constant 0 : index
    %c0_43 = arith.constant 0 : index
    %117 = vector.load %arg5[%c0_42, %c0_43] : memref<128x256xf32, #tpu.memory_space<vmem>>, vector<128x256xf32>
    %cst_44 = arith.constant dense<0.000000e+00> : vector<8x256xf32>
    %118 = tpu.matmul %116, %117, %cst_44 {dimension_numbers = #tpu.dot_dimension_numbers<[1], [0], [0], [1], [0, 0, 1, 1], [], []>} : vector<8x128xf32>, vector<128x256xf32>, vector<8x256xf32> -> vector<8x256xf32>
    %119 = vector.broadcast %8 : vector<1x256xf32> to vector<8x256xf32>
    %120 = arith.addf %118, %119 : vector<8x256xf32>
    %121 = vector.extract_strided_slice %120 {offsets = [0, 0], sizes = [8, 192], strides = [1, 1]} : vector<8x256xf32> to vector<8x192xf32>
    %122 = arith.negf %121 : vector<8x192xf32>
    %123 = math.exp %122 : vector<8x192xf32>
    %cst_45 = arith.constant 1.000000e+00 : f32
    %124 = vector.broadcast %cst_45 : f32 to vector<8x192xf32>
    %125 = arith.addf %124, %123 : vector<8x192xf32>
    %126 = arith.divf %124, %125 : vector<8x192xf32>
    %127 = vector.extract_strided_slice %126 {offsets = [0, 0], sizes = [8, 64], strides = [1, 1]} : vector<8x192xf32> to vector<8x64xf32>
    %128 = vector.extract_strided_slice %126 {offsets = [0, 64], sizes = [8, 64], strides = [1, 1]} : vector<8x192xf32> to vector<8x64xf32>
    %129 = vector.extract_strided_slice %126 {offsets = [0, 128], sizes = [8, 64], strides = [1, 1]} : vector<8x192xf32> to vector<8x64xf32>
    %130 = vector.extract_strided_slice %120 {offsets = [0, 192], sizes = [8, 64], strides = [1, 1]} : vector<8x256xf32> to vector<8x64xf32>
    %131 = math.tanh %130 : vector<8x64xf32>
    %132 = arith.mulf %128, %91 : vector<8x64xf32>
    %133 = arith.mulf %127, %131 : vector<8x64xf32>
    %134 = arith.addf %132, %133 : vector<8x64xf32>
    %135 = math.tanh %134 : vector<8x64xf32>
    %136 = arith.mulf %129, %135 : vector<8x64xf32>
    %c16 = arith.constant 16 : index
    %c0_46 = arith.constant 0 : index
    %137 = vector.load %arg12[%c16, %c0_46] : memref<64x64xf32, #tpu.memory_space<vmem>>, vector<8x64xf32>
    tpu.vector_store %arg12[%c16, %c0_46], %136 {strides = array<i32>} : memref<64x64xf32, #tpu.memory_space<vmem>>, vector<8x64xf32>,
    %c3 = arith.constant 3 : index
    %c0_47 = arith.constant 0 : index
    %c0_48 = arith.constant 0 : index
    %138 = vector.load %arg1[%c3, %c0_47, %c0_48] : memref<8x8x256xf32, #tpu.memory_space<vmem>>, vector<1x8x256xf32>
    %139 = vector.shape_cast %138 : vector<1x8x256xf32> to vector<8x256xf32>
    %c0_49 = arith.constant 0 : index
    %c0_50 = arith.constant 0 : index
    %140 = vector.load %arg4[%c0_49, %c0_50] : memref<64x256xf32, #tpu.memory_space<vmem>>, vector<64x256xf32>
    %cst_51 = arith.constant dense<0.000000e+00> : vector<8x256xf32>
    %141 = tpu.matmul %115, %140, %cst_51 {dimension_numbers = #tpu.dot_dimension_numbers<[1], [0], [0], [1], [0, 0, 1, 1], [], []>} : vector<8x64xf32>, vector<64x256xf32>, vector<8x256xf32> -> vector<8x256xf32>
    %142 = arith.addf %139, %141 : vector<8x256xf32>
    %143 = vector.extract_strided_slice %142 {offsets = [0, 0], sizes = [8, 192], strides = [1, 1]} : vector<8x256xf32> to vector<8x192xf32>
    %144 = arith.negf %143 : vector<8x192xf32>
    %145 = math.exp %144 : vector<8x192xf32>
    %cst_52 = arith.constant 1.000000e+00 : f32
    %146 = vector.broadcast %cst_52 : f32 to vector<8x192xf32>
    %147 = arith.addf %146, %145 : vector<8x192xf32>
    %148 = arith.divf %146, %147 : vector<8x192xf32>
    %149 = vector.extract_strided_slice %148 {offsets = [0, 0], sizes = [8, 64], strides = [1, 1]} : vector<8x192xf32> to vector<8x64xf32>
    %150 = vector.extract_strided_slice %148 {offsets = [0, 64], sizes = [8, 64], strides = [1, 1]} : vector<8x192xf32> to vector<8x64xf32>
    %151 = vector.extract_strided_slice %148 {offsets = [0, 128], sizes = [8, 64], strides = [1, 1]} : vector<8x192xf32> to vector<8x64xf32>
    %152 = vector.extract_strided_slice %142 {offsets = [0, 192], sizes = [8, 64], strides = [1, 1]} : vector<8x256xf32> to vector<8x64xf32>
    %153 = math.tanh %152 : vector<8x64xf32>
    %154 = arith.mulf %150, %113 : vector<8x64xf32>
    %155 = arith.mulf %149, %153 : vector<8x64xf32>
    %156 = arith.addf %154, %155 : vector<8x64xf32>
    %157 = math.tanh %156 : vector<8x64xf32>
    %158 = arith.mulf %151, %157 : vector<8x64xf32>
    %159 = tpu.concatenate %158, %136 in 1 : vector<8x64xf32>, vector<8x64xf32> -> vector<8x128xf32>
    %c0_53 = arith.constant 0 : index
    %c0_54 = arith.constant 0 : index
    %160 = vector.load %arg5[%c0_53, %c0_54] : memref<128x256xf32, #tpu.memory_space<vmem>>, vector<128x256xf32>
    %cst_55 = arith.constant dense<0.000000e+00> : vector<8x256xf32>
    %161 = tpu.matmul %159, %160, %cst_55 {dimension_numbers = #tpu.dot_dimension_numbers<[1], [0], [0], [1], [0, 0, 1, 1], [], []>} : vector<8x128xf32>, vector<128x256xf32>, vector<8x256xf32> -> vector<8x256xf32>
    %162 = vector.broadcast %8 : vector<1x256xf32> to vector<8x256xf32>
    %163 = arith.addf %161, %162 : vector<8x256xf32>
    %164 = vector.extract_strided_slice %163 {offsets = [0, 0], sizes = [8, 192], strides = [1, 1]} : vector<8x256xf32> to vector<8x192xf32>
    %165 = arith.negf %164 : vector<8x192xf32>
    %166 = math.exp %165 : vector<8x192xf32>
    %cst_56 = arith.constant 1.000000e+00 : f32
    %167 = vector.broadcast %cst_56 : f32 to vector<8x192xf32>
    %168 = arith.addf %167, %166 : vector<8x192xf32>
    %169 = arith.divf %167, %168 : vector<8x192xf32>
    %170 = vector.extract_strided_slice %169 {offsets = [0, 0], sizes = [8, 64], strides = [1, 1]} : vector<8x192xf32> to vector<8x64xf32>
    %171 = vector.extract_strided_slice %169 {offsets = [0, 64], sizes = [8, 64], strides = [1, 1]} : vector<8x192xf32> to vector<8x64xf32>
    %172 = vector.extract_strided_slice %169 {offsets = [0, 128], sizes = [8, 64], strides = [1, 1]} : vector<8x192xf32> to vector<8x64xf32>
    %173 = vector.extract_strided_slice %163 {offsets = [0, 192], sizes = [8, 64], strides = [1, 1]} : vector<8x256xf32> to vector<8x64xf32>
    %174 = math.tanh %173 : vector<8x64xf32>
    %175 = arith.mulf %171, %134 : vector<8x64xf32>
    %176 = arith.mulf %170, %174 : vector<8x64xf32>
    %177 = arith.addf %175, %176 : vector<8x64xf32>
    %178 = math.tanh %177 : vector<8x64xf32>
    %179 = arith.mulf %172, %178 : vector<8x64xf32>
    %c24 = arith.constant 24 : index
    %c0_57 = arith.constant 0 : index
    %180 = vector.load %arg12[%c24, %c0_57] : memref<64x64xf32, #tpu.memory_space<vmem>>, vector<8x64xf32>
    tpu.vector_store %arg12[%c24, %c0_57], %179 {strides = array<i32>} : memref<64x64xf32, #tpu.memory_space<vmem>>, vector<8x64xf32>,
    %c4 = arith.constant 4 : index
    %c0_58 = arith.constant 0 : index
    %c0_59 = arith.constant 0 : index
    %181 = vector.load %arg1[%c4, %c0_58, %c0_59] : memref<8x8x256xf32, #tpu.memory_space<vmem>>, vector<1x8x256xf32>
    %182 = vector.shape_cast %181 : vector<1x8x256xf32> to vector<8x256xf32>
    %c0_60 = arith.constant 0 : index
    %c0_61 = arith.constant 0 : index
    %183 = vector.load %arg4[%c0_60, %c0_61] : memref<64x256xf32, #tpu.memory_space<vmem>>, vector<64x256xf32>
    %cst_62 = arith.constant dense<0.000000e+00> : vector<8x256xf32>
    %184 = tpu.matmul %158, %183, %cst_62 {dimension_numbers = #tpu.dot_dimension_numbers<[1], [0], [0], [1], [0, 0, 1, 1], [], []>} : vector<8x64xf32>, vector<64x256xf32>, vector<8x256xf32> -> vector<8x256xf32>
    %185 = arith.addf %182, %184 : vector<8x256xf32>
    %186 = vector.extract_strided_slice %185 {offsets = [0, 0], sizes = [8, 192], strides = [1, 1]} : vector<8x256xf32> to vector<8x192xf32>
    %187 = arith.negf %186 : vector<8x192xf32>
    %188 = math.exp %187 : vector<8x192xf32>
    %cst_63 = arith.constant 1.000000e+00 : f32
    %189 = vector.broadcast %cst_63 : f32 to vector<8x192xf32>
    %190 = arith.addf %189, %188 : vector<8x192xf32>
    %191 = arith.divf %189, %190 : vector<8x192xf32>
    %192 = vector.extract_strided_slice %191 {offsets = [0, 0], sizes = [8, 64], strides = [1, 1]} : vector<8x192xf32> to vector<8x64xf32>
    %193 = vector.extract_strided_slice %191 {offsets = [0, 64], sizes = [8, 64], strides = [1, 1]} : vector<8x192xf32> to vector<8x64xf32>
    %194 = vector.extract_strided_slice %191 {offsets = [0, 128], sizes = [8, 64], strides = [1, 1]} : vector<8x192xf32> to vector<8x64xf32>
    %195 = vector.extract_strided_slice %185 {offsets = [0, 192], sizes = [8, 64], strides = [1, 1]} : vector<8x256xf32> to vector<8x64xf32>
    %196 = math.tanh %195 : vector<8x64xf32>
    %197 = arith.mulf %193, %156 : vector<8x64xf32>
    %198 = arith.mulf %192, %196 : vector<8x64xf32>
    %199 = arith.addf %197, %198 : vector<8x64xf32>
    %200 = math.tanh %199 : vector<8x64xf32>
    %201 = arith.mulf %194, %200 : vector<8x64xf32>
    %202 = tpu.concatenate %201, %179 in 1 : vector<8x64xf32>, vector<8x64xf32> -> vector<8x128xf32>
    %c0_64 = arith.constant 0 : index
    %c0_65 = arith.constant 0 : index
    %203 = vector.load %arg5[%c0_64, %c0_65] : memref<128x256xf32, #tpu.memory_space<vmem>>, vector<128x256xf32>
    %cst_66 = arith.constant dense<0.000000e+00> : vector<8x256xf32>
    %204 = tpu.matmul %202, %203, %cst_66 {dimension_numbers = #tpu.dot_dimension_numbers<[1], [0], [0], [1], [0, 0, 1, 1], [], []>} : vector<8x128xf32>, vector<128x256xf32>, vector<8x256xf32> -> vector<8x256xf32>
    %205 = vector.broadcast %8 : vector<1x256xf32> to vector<8x256xf32>
    %206 = arith.addf %204, %205 : vector<8x256xf32>
    %207 = vector.extract_strided_slice %206 {offsets = [0, 0], sizes = [8, 192], strides = [1, 1]} : vector<8x256xf32> to vector<8x192xf32>
    %208 = arith.negf %207 : vector<8x192xf32>
    %209 = math.exp %208 : vector<8x192xf32>
    %cst_67 = arith.constant 1.000000e+00 : f32
    %210 = vector.broadcast %cst_67 : f32 to vector<8x192xf32>
    %211 = arith.addf %210, %209 : vector<8x192xf32>
    %212 = arith.divf %210, %211 : vector<8x192xf32>
    %213 = vector.extract_strided_slice %212 {offsets = [0, 0], sizes = [8, 64], strides = [1, 1]} : vector<8x192xf32> to vector<8x64xf32>
    %214 = vector.extract_strided_slice %212 {offsets = [0, 64], sizes = [8, 64], strides = [1, 1]} : vector<8x192xf32> to vector<8x64xf32>
    %215 = vector.extract_strided_slice %212 {offsets = [0, 128], sizes = [8, 64], strides = [1, 1]} : vector<8x192xf32> to vector<8x64xf32>
    %216 = vector.extract_strided_slice %206 {offsets = [0, 192], sizes = [8, 64], strides = [1, 1]} : vector<8x256xf32> to vector<8x64xf32>
    %217 = math.tanh %216 : vector<8x64xf32>
    %218 = arith.mulf %214, %177 : vector<8x64xf32>
    %219 = arith.mulf %213, %217 : vector<8x64xf32>
    %220 = arith.addf %218, %219 : vector<8x64xf32>
    %221 = math.tanh %220 : vector<8x64xf32>
    %222 = arith.mulf %215, %221 : vector<8x64xf32>
    %c32 = arith.constant 32 : index
    %c0_68 = arith.constant 0 : index
    %223 = vector.load %arg12[%c32, %c0_68] : memref<64x64xf32, #tpu.memory_space<vmem>>, vector<8x64xf32>
    tpu.vector_store %arg12[%c32, %c0_68], %222 {strides = array<i32>} : memref<64x64xf32, #tpu.memory_space<vmem>>, vector<8x64xf32>,
    %c5 = arith.constant 5 : index
    %c0_69 = arith.constant 0 : index
    %c0_70 = arith.constant 0 : index
    %224 = vector.load %arg1[%c5, %c0_69, %c0_70] : memref<8x8x256xf32, #tpu.memory_space<vmem>>, vector<1x8x256xf32>
    %225 = vector.shape_cast %224 : vector<1x8x256xf32> to vector<8x256xf32>
    %c0_71 = arith.constant 0 : index
    %c0_72 = arith.constant 0 : index
    %226 = vector.load %arg4[%c0_71, %c0_72] : memref<64x256xf32, #tpu.memory_space<vmem>>, vector<64x256xf32>
    %cst_73 = arith.constant dense<0.000000e+00> : vector<8x256xf32>
    %227 = tpu.matmul %201, %226, %cst_73 {dimension_numbers = #tpu.dot_dimension_numbers<[1], [0], [0], [1], [0, 0, 1, 1], [], []>} : vector<8x64xf32>, vector<64x256xf32>, vector<8x256xf32> -> vector<8x256xf32>
    %228 = arith.addf %225, %227 : vector<8x256xf32>
    %229 = vector.extract_strided_slice %228 {offsets = [0, 0], sizes = [8, 192], strides = [1, 1]} : vector<8x256xf32> to vector<8x192xf32>
    %230 = arith.negf %229 : vector<8x192xf32>
    %231 = math.exp %230 : vector<8x192xf32>
    %cst_74 = arith.constant 1.000000e+00 : f32
    %232 = vector.broadcast %cst_74 : f32 to vector<8x192xf32>
    %233 = arith.addf %232, %231 : vector<8x192xf32>
    %234 = arith.divf %232, %233 : vector<8x192xf32>
    %235 = vector.extract_strided_slice %234 {offsets = [0, 0], sizes = [8, 64], strides = [1, 1]} : vector<8x192xf32> to vector<8x64xf32>
    %236 = vector.extract_strided_slice %234 {offsets = [0, 64], sizes = [8, 64], strides = [1, 1]} : vector<8x192xf32> to vector<8x64xf32>
    %237 = vector.extract_strided_slice %234 {offsets = [0, 128], sizes = [8, 64], strides = [1, 1]} : vector<8x192xf32> to vector<8x64xf32>
    %238 = vector.extract_strided_slice %228 {offsets = [0, 192], sizes = [8, 64], strides = [1, 1]} : vector<8x256xf32> to vector<8x64xf32>
    %239 = math.tanh %238 : vector<8x64xf32>
    %240 = arith.mulf %236, %199 : vector<8x64xf32>
    %241 = arith.mulf %235, %239 : vector<8x64xf32>
    %242 = arith.addf %240, %241 : vector<8x64xf32>
    %243 = math.tanh %242 : vector<8x64xf32>
    %244 = arith.mulf %237, %243 : vector<8x64xf32>
    %245 = tpu.concatenate %244, %222 in 1 : vector<8x64xf32>, vector<8x64xf32> -> vector<8x128xf32>
    %c0_75 = arith.constant 0 : index
    %c0_76 = arith.constant 0 : index
    %246 = vector.load %arg5[%c0_75, %c0_76] : memref<128x256xf32, #tpu.memory_space<vmem>>, vector<128x256xf32>
    %cst_77 = arith.constant dense<0.000000e+00> : vector<8x256xf32>
    %247 = tpu.matmul %245, %246, %cst_77 {dimension_numbers = #tpu.dot_dimension_numbers<[1], [0], [0], [1], [0, 0, 1, 1], [], []>} : vector<8x128xf32>, vector<128x256xf32>, vector<8x256xf32> -> vector<8x256xf32>
    %248 = vector.broadcast %8 : vector<1x256xf32> to vector<8x256xf32>
    %249 = arith.addf %247, %248 : vector<8x256xf32>
    %250 = vector.extract_strided_slice %249 {offsets = [0, 0], sizes = [8, 192], strides = [1, 1]} : vector<8x256xf32> to vector<8x192xf32>
    %251 = arith.negf %250 : vector<8x192xf32>
    %252 = math.exp %251 : vector<8x192xf32>
    %cst_78 = arith.constant 1.000000e+00 : f32
    %253 = vector.broadcast %cst_78 : f32 to vector<8x192xf32>
    %254 = arith.addf %253, %252 : vector<8x192xf32>
    %255 = arith.divf %253, %254 : vector<8x192xf32>
    %256 = vector.extract_strided_slice %255 {offsets = [0, 0], sizes = [8, 64], strides = [1, 1]} : vector<8x192xf32> to vector<8x64xf32>
    %257 = vector.extract_strided_slice %255 {offsets = [0, 64], sizes = [8, 64], strides = [1, 1]} : vector<8x192xf32> to vector<8x64xf32>
    %258 = vector.extract_strided_slice %255 {offsets = [0, 128], sizes = [8, 64], strides = [1, 1]} : vector<8x192xf32> to vector<8x64xf32>
    %259 = vector.extract_strided_slice %249 {offsets = [0, 192], sizes = [8, 64], strides = [1, 1]} : vector<8x256xf32> to vector<8x64xf32>
    %260 = math.tanh %259 : vector<8x64xf32>
    %261 = arith.mulf %257, %220 : vector<8x64xf32>
    %262 = arith.mulf %256, %260 : vector<8x64xf32>
    %263 = arith.addf %261, %262 : vector<8x64xf32>
    %264 = math.tanh %263 : vector<8x64xf32>
    %265 = arith.mulf %258, %264 : vector<8x64xf32>
    %c40 = arith.constant 40 : index
    %c0_79 = arith.constant 0 : index
    %266 = vector.load %arg12[%c40, %c0_79] : memref<64x64xf32, #tpu.memory_space<vmem>>, vector<8x64xf32>
    tpu.vector_store %arg12[%c40, %c0_79], %265 {strides = array<i32>} : memref<64x64xf32, #tpu.memory_space<vmem>>, vector<8x64xf32>,
    %c6 = arith.constant 6 : index
    %c0_80 = arith.constant 0 : index
    %c0_81 = arith.constant 0 : index
    %267 = vector.load %arg1[%c6, %c0_80, %c0_81] : memref<8x8x256xf32, #tpu.memory_space<vmem>>, vector<1x8x256xf32>
    %268 = vector.shape_cast %267 : vector<1x8x256xf32> to vector<8x256xf32>
    %c0_82 = arith.constant 0 : index
    %c0_83 = arith.constant 0 : index
    %269 = vector.load %arg4[%c0_82, %c0_83] : memref<64x256xf32, #tpu.memory_space<vmem>>, vector<64x256xf32>
    %cst_84 = arith.constant dense<0.000000e+00> : vector<8x256xf32>
    %270 = tpu.matmul %244, %269, %cst_84 {dimension_numbers = #tpu.dot_dimension_numbers<[1], [0], [0], [1], [0, 0, 1, 1], [], []>} : vector<8x64xf32>, vector<64x256xf32>, vector<8x256xf32> -> vector<8x256xf32>
    %271 = arith.addf %268, %270 : vector<8x256xf32>
    %272 = vector.extract_strided_slice %271 {offsets = [0, 0], sizes = [8, 192], strides = [1, 1]} : vector<8x256xf32> to vector<8x192xf32>
    %273 = arith.negf %272 : vector<8x192xf32>
    %274 = math.exp %273 : vector<8x192xf32>
    %cst_85 = arith.constant 1.000000e+00 : f32
    %275 = vector.broadcast %cst_85 : f32 to vector<8x192xf32>
    %276 = arith.addf %275, %274 : vector<8x192xf32>
    %277 = arith.divf %275, %276 : vector<8x192xf32>
    %278 = vector.extract_strided_slice %277 {offsets = [0, 0], sizes = [8, 64], strides = [1, 1]} : vector<8x192xf32> to vector<8x64xf32>
    %279 = vector.extract_strided_slice %277 {offsets = [0, 64], sizes = [8, 64], strides = [1, 1]} : vector<8x192xf32> to vector<8x64xf32>
    %280 = vector.extract_strided_slice %277 {offsets = [0, 128], sizes = [8, 64], strides = [1, 1]} : vector<8x192xf32> to vector<8x64xf32>
    %281 = vector.extract_strided_slice %271 {offsets = [0, 192], sizes = [8, 64], strides = [1, 1]} : vector<8x256xf32> to vector<8x64xf32>
    %282 = math.tanh %281 : vector<8x64xf32>
    %283 = arith.mulf %279, %242 : vector<8x64xf32>
    %284 = arith.mulf %278, %282 : vector<8x64xf32>
    %285 = arith.addf %283, %284 : vector<8x64xf32>
    %286 = math.tanh %285 : vector<8x64xf32>
    %287 = arith.mulf %280, %286 : vector<8x64xf32>
    %288 = tpu.concatenate %287, %265 in 1 : vector<8x64xf32>, vector<8x64xf32> -> vector<8x128xf32>
    %c0_86 = arith.constant 0 : index
    %c0_87 = arith.constant 0 : index
    %289 = vector.load %arg5[%c0_86, %c0_87] : memref<128x256xf32, #tpu.memory_space<vmem>>, vector<128x256xf32>
    %cst_88 = arith.constant dense<0.000000e+00> : vector<8x256xf32>
    %290 = tpu.matmul %288, %289, %cst_88 {dimension_numbers = #tpu.dot_dimension_numbers<[1], [0], [0], [1], [0, 0, 1, 1], [], []>} : vector<8x128xf32>, vector<128x256xf32>, vector<8x256xf32> -> vector<8x256xf32>
    %291 = vector.broadcast %8 : vector<1x256xf32> to vector<8x256xf32>
    %292 = arith.addf %290, %291 : vector<8x256xf32>
    %293 = vector.extract_strided_slice %292 {offsets = [0, 0], sizes = [8, 192], strides = [1, 1]} : vector<8x256xf32> to vector<8x192xf32>
    %294 = arith.negf %293 : vector<8x192xf32>
    %295 = math.exp %294 : vector<8x192xf32>
    %cst_89 = arith.constant 1.000000e+00 : f32
    %296 = vector.broadcast %cst_89 : f32 to vector<8x192xf32>
    %297 = arith.addf %296, %295 : vector<8x192xf32>
    %298 = arith.divf %296, %297 : vector<8x192xf32>
    %299 = vector.extract_strided_slice %298 {offsets = [0, 0], sizes = [8, 64], strides = [1, 1]} : vector<8x192xf32> to vector<8x64xf32>
    %300 = vector.extract_strided_slice %298 {offsets = [0, 64], sizes = [8, 64], strides = [1, 1]} : vector<8x192xf32> to vector<8x64xf32>
    %301 = vector.extract_strided_slice %298 {offsets = [0, 128], sizes = [8, 64], strides = [1, 1]} : vector<8x192xf32> to vector<8x64xf32>
    %302 = vector.extract_strided_slice %292 {offsets = [0, 192], sizes = [8, 64], strides = [1, 1]} : vector<8x256xf32> to vector<8x64xf32>
    %303 = math.tanh %302 : vector<8x64xf32>
    %304 = arith.mulf %300, %263 : vector<8x64xf32>
    %305 = arith.mulf %299, %303 : vector<8x64xf32>
    %306 = arith.addf %304, %305 : vector<8x64xf32>
    %307 = math.tanh %306 : vector<8x64xf32>
    %308 = arith.mulf %301, %307 : vector<8x64xf32>
    %c48 = arith.constant 48 : index
    %c0_90 = arith.constant 0 : index
    %309 = vector.load %arg12[%c48, %c0_90] : memref<64x64xf32, #tpu.memory_space<vmem>>, vector<8x64xf32>
    tpu.vector_store %arg12[%c48, %c0_90], %308 {strides = array<i32>} : memref<64x64xf32, #tpu.memory_space<vmem>>, vector<8x64xf32>,
    %c7 = arith.constant 7 : index
    %c0_91 = arith.constant 0 : index
    %c0_92 = arith.constant 0 : index
    %310 = vector.load %arg1[%c7, %c0_91, %c0_92] : memref<8x8x256xf32, #tpu.memory_space<vmem>>, vector<1x8x256xf32>
    %311 = vector.shape_cast %310 : vector<1x8x256xf32> to vector<8x256xf32>
    %c0_93 = arith.constant 0 : index
    %c0_94 = arith.constant 0 : index
    %312 = vector.load %arg4[%c0_93, %c0_94] : memref<64x256xf32, #tpu.memory_space<vmem>>, vector<64x256xf32>
    %cst_95 = arith.constant dense<0.000000e+00> : vector<8x256xf32>
    %313 = tpu.matmul %287, %312, %cst_95 {dimension_numbers = #tpu.dot_dimension_numbers<[1], [0], [0], [1], [0, 0, 1, 1], [], []>} : vector<8x64xf32>, vector<64x256xf32>, vector<8x256xf32> -> vector<8x256xf32>
    %314 = arith.addf %311, %313 : vector<8x256xf32>
    %315 = vector.extract_strided_slice %314 {offsets = [0, 0], sizes = [8, 192], strides = [1, 1]} : vector<8x256xf32> to vector<8x192xf32>
    %316 = arith.negf %315 : vector<8x192xf32>
    %317 = math.exp %316 : vector<8x192xf32>
    %cst_96 = arith.constant 1.000000e+00 : f32
    %318 = vector.broadcast %cst_96 : f32 to vector<8x192xf32>
    %319 = arith.addf %318, %317 : vector<8x192xf32>
    %320 = arith.divf %318, %319 : vector<8x192xf32>
    %321 = vector.extract_strided_slice %320 {offsets = [0, 0], sizes = [8, 64], strides = [1, 1]} : vector<8x192xf32> to vector<8x64xf32>
    %322 = vector.extract_strided_slice %320 {offsets = [0, 64], sizes = [8, 64], strides = [1, 1]} : vector<8x192xf32> to vector<8x64xf32>
    %323 = vector.extract_strided_slice %320 {offsets = [0, 128], sizes = [8, 64], strides = [1, 1]} : vector<8x192xf32> to vector<8x64xf32>
    %324 = vector.extract_strided_slice %314 {offsets = [0, 192], sizes = [8, 64], strides = [1, 1]} : vector<8x256xf32> to vector<8x64xf32>
    %325 = math.tanh %324 : vector<8x64xf32>
    %326 = arith.mulf %322, %285 : vector<8x64xf32>
    %327 = arith.mulf %321, %325 : vector<8x64xf32>
    %328 = arith.addf %326, %327 : vector<8x64xf32>
    %329 = math.tanh %328 : vector<8x64xf32>
    %330 = arith.mulf %323, %329 : vector<8x64xf32>
    %331 = tpu.concatenate %330, %308 in 1 : vector<8x64xf32>, vector<8x64xf32> -> vector<8x128xf32>
    %c0_97 = arith.constant 0 : index
    %c0_98 = arith.constant 0 : index
    %332 = vector.load %arg5[%c0_97, %c0_98] : memref<128x256xf32, #tpu.memory_space<vmem>>, vector<128x256xf32>
    %cst_99 = arith.constant dense<0.000000e+00> : vector<8x256xf32>
    %333 = tpu.matmul %331, %332, %cst_99 {dimension_numbers = #tpu.dot_dimension_numbers<[1], [0], [0], [1], [0, 0, 1, 1], [], []>} : vector<8x128xf32>, vector<128x256xf32>, vector<8x256xf32> -> vector<8x256xf32>
    %334 = vector.broadcast %8 : vector<1x256xf32> to vector<8x256xf32>
    %335 = arith.addf %333, %334 : vector<8x256xf32>
    %336 = vector.extract_strided_slice %335 {offsets = [0, 0], sizes = [8, 192], strides = [1, 1]} : vector<8x256xf32> to vector<8x192xf32>
    %337 = arith.negf %336 : vector<8x192xf32>
    %338 = math.exp %337 : vector<8x192xf32>
    %cst_100 = arith.constant 1.000000e+00 : f32
    %339 = vector.broadcast %cst_100 : f32 to vector<8x192xf32>
    %340 = arith.addf %339, %338 : vector<8x192xf32>
    %341 = arith.divf %339, %340 : vector<8x192xf32>
    %342 = vector.extract_strided_slice %341 {offsets = [0, 0], sizes = [8, 64], strides = [1, 1]} : vector<8x192xf32> to vector<8x64xf32>
    %343 = vector.extract_strided_slice %341 {offsets = [0, 64], sizes = [8, 64], strides = [1, 1]} : vector<8x192xf32> to vector<8x64xf32>
    %344 = vector.extract_strided_slice %341 {offsets = [0, 128], sizes = [8, 64], strides = [1, 1]} : vector<8x192xf32> to vector<8x64xf32>
    %345 = vector.extract_strided_slice %335 {offsets = [0, 192], sizes = [8, 64], strides = [1, 1]} : vector<8x256xf32> to vector<8x64xf32>
    %346 = math.tanh %345 : vector<8x64xf32>
    %347 = arith.mulf %343, %306 : vector<8x64xf32>
    %348 = arith.mulf %342, %346 : vector<8x64xf32>
    %349 = arith.addf %347, %348 : vector<8x64xf32>
    %350 = math.tanh %349 : vector<8x64xf32>
    %351 = arith.mulf %344, %350 : vector<8x64xf32>
    %c56 = arith.constant 56 : index
    %c0_101 = arith.constant 0 : index
    %352 = vector.load %arg12[%c56, %c0_101] : memref<64x64xf32, #tpu.memory_space<vmem>>, vector<8x64xf32>
    tpu.vector_store %arg12[%c56, %c0_101], %351 {strides = array<i32>} : memref<64x64xf32, #tpu.memory_space<vmem>>, vector<8x64xf32>,
    %c0_102 = arith.constant 0 : index
    %c0_103 = arith.constant 0 : index
    %c0_104 = arith.constant 0 : index
    %353 = vector.load %arg10[%c0_102, %c0_103, %c0_104] : memref<2x8x64xf32, #tpu.memory_space<vmem>>, vector<1x8x64xf32>
    %354 = vector.shape_cast %353 : vector<1x8x64xf32> to vector<8x64xf32>
    %355 = vector.shape_cast %330 : vector<8x64xf32> to vector<1x8x64xf32>
    tpu.vector_store %arg10[%c0_102, %c0_103, %c0_104], %355 {strides = array<i32>} : memref<2x8x64xf32, #tpu.memory_space<vmem>>, vector<1x8x64xf32>,
    %c1_105 = arith.constant 1 : index
    %c0_106 = arith.constant 0 : index
    %c0_107 = arith.constant 0 : index
    %356 = vector.load %arg10[%c1_105, %c0_106, %c0_107] : memref<2x8x64xf32, #tpu.memory_space<vmem>>, vector<1x8x64xf32>
    %357 = vector.shape_cast %356 : vector<1x8x64xf32> to vector<8x64xf32>
    %358 = vector.shape_cast %351 : vector<8x64xf32> to vector<1x8x64xf32>
    tpu.vector_store %arg10[%c1_105, %c0_106, %c0_107], %358 {strides = array<i32>} : memref<2x8x64xf32, #tpu.memory_space<vmem>>, vector<1x8x64xf32>,
    %c0_108 = arith.constant 0 : index
    %c0_109 = arith.constant 0 : index
    %c0_110 = arith.constant 0 : index
    %359 = vector.load %arg11[%c0_108, %c0_109, %c0_110] : memref<2x8x64xf32, #tpu.memory_space<vmem>>, vector<1x8x64xf32>
    %360 = vector.shape_cast %359 : vector<1x8x64xf32> to vector<8x64xf32>
    %361 = vector.shape_cast %328 : vector<8x64xf32> to vector<1x8x64xf32>
    tpu.vector_store %arg11[%c0_108, %c0_109, %c0_110], %361 {strides = array<i32>} : memref<2x8x64xf32, #tpu.memory_space<vmem>>, vector<1x8x64xf32>,
    %c1_111 = arith.constant 1 : index
    %c0_112 = arith.constant 0 : index
    %c0_113 = arith.constant 0 : index
    %362 = vector.load %arg11[%c1_111, %c0_112, %c0_113] : memref<2x8x64xf32, #tpu.memory_space<vmem>>, vector<1x8x64xf32>
    %363 = vector.shape_cast %362 : vector<1x8x64xf32> to vector<8x64xf32>
    %364 = vector.shape_cast %349 : vector<8x64xf32> to vector<1x8x64xf32>
    tpu.vector_store %arg11[%c1_111, %c0_112, %c0_113], %364 {strides = array<i32>} : memref<2x8x64xf32, #tpu.memory_space<vmem>>, vector<1x8x64xf32>,
    %c0_114 = arith.constant 0 : index
    %c0_115 = arith.constant 0 : index
    %365 = vector.load %arg12[%c0_114, %c0_115] : memref<64x64xf32, #tpu.memory_space<vmem>>, vector<64x64xf32>
    %c0_116 = arith.constant 0 : index
    %c0_117 = arith.constant 0 : index
    %366 = vector.load %arg7[%c0_116, %c0_117] : memref<64x128xf32, #tpu.memory_space<vmem>>, vector<64x128xf32>
    %cst_118 = arith.constant dense<0.000000e+00> : vector<64x128xf32>
    %367 = tpu.matmul %365, %366, %cst_118 {dimension_numbers = #tpu.dot_dimension_numbers<[1], [0], [0], [1], [0, 0, 1, 1], [], []>} : vector<64x64xf32>, vector<64x128xf32>, vector<64x128xf32> -> vector<64x128xf32>
    %c0_119 = arith.constant 0 : index
    %c0_120 = arith.constant 0 : index
    %368 = vector.load %arg8[%c0_119, %c0_120] : memref<1x128xf32, #tpu.memory_space<vmem>>, vector<1x128xf32>
    %369 = vector.broadcast %368 : vector<1x128xf32> to vector<64x128xf32>
    %370 = arith.addf %367, %369 : vector<64x128xf32>
    %c0_121 = arith.constant 0 : index
    %c0_122 = arith.constant 0 : index
    %371 = vector.load %arg9[%c0_121, %c0_122] : memref<64x128xf32, #tpu.memory_space<vmem>>, vector<64x128xf32>
    tpu.vector_store %arg9[%c0_121, %c0_122], %370 {strides = array<i32>} : memref<64x128xf32, #tpu.memory_space<vmem>>, vector<64x128xf32>,
    return
  }
  func.func @transform_0(%arg0: i32) -> (i32, i32, i32) {
    %c0_i32 = arith.constant 0 : i32
    %c0_i32_0 = arith.constant 0 : i32
    %c0_i32_1 = arith.constant 0 : i32
    %c0_i32_2 = arith.constant 0 : i32
    return %c0_i32, %c0_i32_0, %c0_i32_1 : i32, i32, i32
  }
  func.func @transform_1(%arg0: i32) -> (i32, i32, i32) {
    %c0_i32 = arith.constant 0 : i32
    %c0_i32_0 = arith.constant 0 : i32
    %c0_i32_1 = arith.constant 0 : i32
    %c0_i32_2 = arith.constant 0 : i32
    return %c0_i32, %c0_i32_0, %c0_i32_1 : i32, i32, i32
  }
  func.func @transform_2(%arg0: i32) -> (i32, i32, i32) {
    %c0_i32 = arith.constant 0 : i32
    %c0_i32_0 = arith.constant 0 : i32
    %c0_i32_1 = arith.constant 0 : i32
    %c0_i32_2 = arith.constant 0 : i32
    return %c0_i32, %c0_i32_0, %c0_i32_1 : i32, i32, i32
  }
  func.func @transform_3(%arg0: i32) -> (i32, i32) {
    %c0_i32 = arith.constant 0 : i32
    %c0_i32_0 = arith.constant 0 : i32
    %c0_i32_1 = arith.constant 0 : i32
    return %c0_i32, %c0_i32_0 : i32, i32
  }
  func.func @transform_4(%arg0: i32) -> (i32, i32) {
    %c0_i32 = arith.constant 0 : i32
    %c0_i32_0 = arith.constant 0 : i32
    %c0_i32_1 = arith.constant 0 : i32
    return %c0_i32, %c0_i32_0 : i32, i32
  }
  func.func @transform_5(%arg0: i32) -> (i32, i32) {
    %c0_i32 = arith.constant 0 : i32
    %c0_i32_0 = arith.constant 0 : i32
    %c0_i32_1 = arith.constant 0 : i32
    return %c0_i32, %c0_i32_0 : i32, i32
  }
  func.func @transform_6(%arg0: i32) -> (i32, i32) {
    %c0_i32 = arith.constant 0 : i32
    %c0_i32_0 = arith.constant 0 : i32
    %c0_i32_1 = arith.constant 0 : i32
    return %c0_i32, %c0_i32_0 : i32, i32
  }
  func.func @transform_7(%arg0: i32) -> (i32, i32) {
    %c0_i32 = arith.constant 0 : i32
    %c0_i32_0 = arith.constant 0 : i32
    %c0_i32_1 = arith.constant 0 : i32
    return %c0_i32, %c0_i32_0 : i32, i32
  }
  func.func @transform_8(%arg0: i32) -> (i32, i32) {
    %c0_i32 = arith.constant 0 : i32
    %c0_i32_0 = arith.constant 0 : i32
    %c0_i32_1 = arith.constant 0 : i32
    return %c0_i32, %c0_i32_0 : i32, i32
  }
  func.func @transform_9(%arg0: i32) -> (i32, i32, i32) {
    %c0_i32 = arith.constant 0 : i32
    %c0_i32_0 = arith.constant 0 : i32
    %c0_i32_1 = arith.constant 0 : i32
    %c0_i32_2 = arith.constant 0 : i32
    return %c0_i32, %c0_i32_0, %c0_i32_1 : i32, i32, i32
  }
  func.func @transform_10(%arg0: i32) -> (i32, i32, i32) {
    %c0_i32 = arith.constant 0 : i32
    %c0_i32_0 = arith.constant 0 : i32
    %c0_i32_1 = arith.constant 0 : i32
    %c0_i32_2 = arith.constant 0 : i32
    return %c0_i32, %c0_i32_0, %c0_i32_1 : i32, i32, i32
  }
}

</mosaic_0001>

<bundles_post_ra>
// kernel: diminutive_generator_forward.1
= control target key start
LH: loop header
LB: loop body
LE: loop exit
PB: predicated region body
PF: predicated region fallthrough
CT: control target
= control target key end

     0   :  { %v3061_v3 = vmov 0.0   ;;  %vm57_vm0 = vcmask 523264   ;;  %s3062_s29 = smov 64   ;;  %s4113_s3 = inlined_call_operand.vmem [shape: f32[64,256], index: 3, kind: input, shape index: {}]   ;;  %s4114_s1 = inlined_call_operand.vmem [shape: f32[2,8,64], index: 1, kind: input, shape index: {}]   ;;  %s4115_s0 = inlined_call_operand.vmem [shape: f32[8,8,256], index: 0, kind: input, shape index: {}]   ;;  %s4116_s2 = inlined_call_operand.vmem [shape: f32[2,8,64], index: 2, kind: input, shape index: {}]   ;;  %s4117_s4 = inlined_call_operand.vmem [shape: f32[128,256], index: 4, kind: input, shape index: {}]   ;;  %s4118_s5 = inlined_call_operand.vmem [shape: f32[1,256], index: 5, kind: input, shape index: {}]   ;;  %s4119_s6 = inlined_call_operand.vmem [shape: f32[64,128], index: 6, kind: input, shape index: {}]   ;;  %s4120_s7 = inlined_call_operand.vmem [shape: f32[1,128], index: 7, kind: input, shape index: {}]   ;;  %s4121_s8 = inlined_call_operand.vmem [shape: f32[64,128], index: 8, kind: output, shape index: {0}]   ;;  %s4122_s9 = inlined_call_operand.vmem [shape: f32[2,8,64], index: 9, kind: output, shape index: {1}]   ;;  %s4123_s10 = inlined_call_operand.vmem [shape: f32[2,8,64], index: 10, kind: output, shape index: {2}]  }
   0x1   :  { %v42_v0 = vld [vmem:[%s4113_s3 + $0x8] sm:$0xff]  ;;  %v44_v1 = vld [vmem:[%s4113_s3 + $0x18] sm:$0xff]  ;;  %v41_v2 = vld [vmem:[%s4113_s3] sm:$0xff]  ;;  %125 = vmatprep.mubr.f32.mxu0 %v3061_v3  ;;  %280 = vmatprep.mubr.f32.mxu1 %v3061_v3 }
   0x2   :  { %v3129_v4 = vpack.c.bf16 %v44_v1, %v42_v0  ;;  %v43_v5 = vld [vmem:[%s4113_s3 + $0x10] sm:$0xff]  ;;  %v46_v6 = vld [vmem:[%s4113_s3 + $0x28] sm:$0xff]  ;;  %v48_v7 = vld [vmem:[%s4113_s3 + $0x38] sm:$0xff] }
   0x3   :  { %v3140_v8 = vpack.c.bf16 %v43_v5, %v41_v2  ;;  %v3142_v9 = vpack.c.bf16 %v48_v7, %v46_v6  ;;  %v45_v10 = vld [vmem:[%s4113_s3 + $0x20] sm:$0xff]  ;;  %v47_v11 = vld [vmem:[%s4113_s3 + $0x30] sm:$0xff]  ;;  %v50_v12 = vld [vmem:[%s4113_s3 + $0x48] sm:$0xff] }
   0x4   :  { %2468 = vmatprep.subr.bf16.mxu0 %v3129_v4  ;;  %v52_v13 = vld [vmem:[%s4113_s3 + $0x58] sm:$0xff]  ;;  %v3158_v14 = vpack.c.bf16 %v47_v11, %v45_v10  ;;  %v49_v16 = vld [vmem:[%s4113_s3 + $0x40] sm:$0xff]  ;;  %v51_v17 = vld [vmem:[%s4113_s3 + $0x50] sm:$0xff] }
   0x5   :  { %2470 = vmatpush1.bf16.msra.mxu0 %v3140_v8  ;;  %v3161_v15 = vpack.c.bf16 %v52_v13, %v50_v12  ;;  %v54_v18 = vld [vmem:[%s4113_s3 + $0x68] sm:$0xff]  ;;  %v56_v19 = vld [vmem:[%s4113_s3 + $0x78] sm:$0xff]  ;;  %v3176_v20 = vpack.c.bf16 %v51_v17, %v49_v16  ;;  %v53_v22 = vld [vmem:[%s4113_s3 + $0x60] sm:$0xff] }
   0x6   :  { %2472 = vmatprep.subr.bf16.mxu0 %v3142_v9  ;;  %v3179_v21 = vpack.c.bf16 %v56_v19, %v54_v18  ;;  %v55_v23 = vld [vmem:[%s4113_s3 + $0x70] sm:$0xff]  ;;  %v32_v25 = vld [vmem:[%s4114_s1] sm:$0xff]  ;;  %v40_v26 = vld [vmem:[%s4115_s0 + $0x8] sm:$0xff] }
   0x7   :  { %v3188_v24 = vpack.c.bf16 %v55_v23, %v53_v22  ;;  %v35_v31 = vld [vmem:[%s4116_s2] sm:$0xff]  ;;  %v2356_v40 = vld [vmem:[%s4114_s1 + $0x8] sm:$0xff]  ;;  %v176_v42 = vld [vmem:[%s4117_s4 + $0x18] sm:$0xff] }
   0x8   :  { %v39_v32 = vld [vmem:[%s4115_s0] sm:$0xff]  ;;  %v174_v41 = vld [vmem:[%s4117_s4 + $0x8] sm:$0xff]  ;;  %v175_v45 = vld [vmem:[%s4117_s4 + $0x10] sm:$0xff] }
   0x9   :  { %2474 = vmatpush1.bf16.msra.mxu0 %v3158_v14  ;;  %v173_v43 = vld [vmem:[%s4117_s4] sm:$0xff]  ;;  %v3236_v44 = vpack.c.bf16 %v176_v42, %v174_v41  ;;  %v178_v46 = vld [vmem:[%s4117_s4 + $0x28] sm:$0xff]  ;;  %v180_v47 = vld [vmem:[%s4117_s4 + $0x38] sm:$0xff] }
   0xa   :  { %2476 = vmatprep.subr.bf16.mxu0 %v3161_v15  ;;  %v3247_v48 = vpack.c.bf16 %v175_v45, %v173_v43  ;;  %v3249_v49 = vpack.c.bf16 %v180_v47, %v178_v46  ;;  %v177_v50 = vld [vmem:[%s4117_s4 + $0x20] sm:$0xff]  ;;  %v179_v51 = vld [vmem:[%s4117_s4 + $0x30] sm:$0xff]  ;;  %v182_v52 = vld [vmem:[%s4117_s4 + $0x48] sm:$0xff] }
   0xb   :  { %2484 = vmatprep.subr.bf16.mxu1 %v3236_v44  ;;  %v184_v53 = vld [vmem:[%s4117_s4 + $0x58] sm:$0xff]  ;;  %v3266_v54 = vpack.c.bf16 %v179_v51, %v177_v50  ;;  %v181_v56 = vld [vmem:[%s4117_s4 + $0x40] sm:$0xff]  ;;  %v183_v57 = vld [vmem:[%s4117_s4 + $0x50] sm:$0xff] }
   0xc   :  { %2486 = vmatpush1.bf16.msra.mxu1 %v3247_v48  ;;  %v3269_v55 = vpack.c.bf16 %v184_v53, %v182_v52  ;;  %v186_v58 = vld [vmem:[%s4117_s4 + $0x68] sm:$0xff]  ;;  %v188_v59 = vld [vmem:[%s4117_s4 + $0x78] sm:$0xff]  ;;  %v3284_v60 = vpack.c.bf16 %v183_v57, %v181_v56  ;;  %v185_v62 = vld [vmem:[%s4117_s4 + $0x60] sm:$0xff] }
   0xd   :  { %2478 = vmatpush1.bf16.msra.mxu0 %v3176_v20  ;;  %2488 = vmatprep.subr.bf16.mxu1 %v3249_v49  ;;  %v3287_v61 = vpack.c.bf16 %v188_v59, %v186_v58  ;;  %v187_v63 = vld [vmem:[%s4117_s4 + $0x70] sm:$0xff]  ;;  %v190_v0 = vld [vmem:[%s4117_s4 + $0x88] sm:$0xff]  ;;  %v192_v1 = vld [vmem:[%s4117_s4 + $0x98] sm:$0xff] }
   0xe   :  { %2480 = vmatprep.subr.bf16.mxu0 %v3179_v21  ;;  %v3302_v2 = vpack.c.bf16 %v187_v63, %v185_v62  ;;  %v3305_v5 = vpack.c.bf16 %v192_v1, %v190_v0  ;;  %v189_v6 = vld [vmem:[%s4117_s4 + $0x80] sm:$0xff]  ;;  %v191_v7 = vld [vmem:[%s4117_s4 + $0x90] sm:$0xff]  ;;  %v194_v10 = vld [vmem:[%s4117_s4 + $0xa8] sm:$0xff] }
   0xf   :  { %v196_v11 = vld [vmem:[%s4117_s4 + $0xb8] sm:$0xff]  ;;  %v3320_v12 = vpack.c.bf16 %v191_v7, %v189_v6  ;;  %v193_v16 = vld [vmem:[%s4117_s4 + $0xa0] sm:$0xff]  ;;  %v195_v17 = vld [vmem:[%s4117_s4 + $0xb0] sm:$0xff] }
  0x10   :  { %2490 = vmatpush1.bf16.msra.mxu1 %v3266_v54  ;;  %v3323_v13 = vpack.c.bf16 %v196_v11, %v194_v10  ;;  %v198_v18 = vld [vmem:[%s4117_s4 + $0xc8] sm:$0xff]  ;;  %v200_v19 = vld [vmem:[%s4117_s4 + $0xd8] sm:$0xff]  ;;  %v3338_v22 = vpack.c.bf16 %v195_v17, %v193_v16  ;;  %v2363_v16 = vld [vmem:[%s4115_s0 + $0x10] sm:$0xff] }
  0x11   :  { %2482 = vmatpush1.bf16.msra.mxu0 %v3188_v24  ;;  %2492 = vmatprep.subr.bf16.mxu1 %v3269_v55  ;;  %v3341_v23 = vpack.c.bf16 %v200_v19, %v198_v18 }
  0x12   :  { %2516 = vmatprep.subr.bf16.mxu0 %v3129_v4 }
  0x14   :  { %2358 = vmatmul.mubr.msk.f32.vlgmr.msra.gmra.mrb[0].mxu0 %vm57_vm0, %v32_v25  ;;  %2494 = vmatpush1.bf16.msra.mxu1 %v3284_v60  ;;  %v197_v25 = vld [vmem:[%s4117_s4 + $0xc0] sm:$0xff] }
  0x15   :  { %2518 = vmatpush1.bf16.msra.mxu0 %v3140_v8  ;;  %408 = vmatprep.mubr.f32.mxu0 %v3061_v3 }
  0x16   :  { %2520 = vmatprep.subr.bf16.mxu0 %v3142_v9  ;;  %2496 = vmatprep.subr.bf16.mxu1 %v3287_v61 }
  0x18   :  { %2498 = vmatpush1.bf16.msra.mxu1 %v3302_v2 }
  0x19   :  { %2522 = vmatpush1.bf16.msra.mxu0 %v3158_v14  ;;  %2500 = vmatprep.subr.bf16.mxu1 %v3305_v5 }
  0x1a   :  { %2524 = vmatprep.subr.bf16.mxu0 %v3161_v15 }
  0x1c   :  { %2502 = vmatpush1.bf16.msra.mxu1 %v3320_v12 }
  0x1d   :  { %2526 = vmatpush1.bf16.msra.mxu0 %v3176_v20  ;;  %2504 = vmatprep.subr.bf16.mxu1 %v3323_v13 }
  0x1e   :  { %2528 = vmatprep.subr.bf16.mxu0 %v3179_v21 }
  0x20   :  { %2506 = vmatpush1.bf16.msra.mxu1 %v3338_v22 }
  0x21   :  { %2530 = vmatpush1.bf16.msra.mxu0 %v3188_v24  ;;  %2508 = vmatprep.subr.bf16.mxu1 %v3341_v23 }
  0x22   :  { %2532 = vmatprep.subr.bf16.mxu0 %v3236_v44 }
  0xe7   :  { %v127_v27 = vpop.f32.mrb[0].mxu0 }
  0xe8   :  { %v129_v28 = vpop.f32.mrb[1].mxu0  ;;  %v132_v33 = vadd.f32 %v127_v27, %v39_v32  ;;  %v202_v27 = vld [vmem:[%s4117_s4 + $0xe8] sm:$0xff] }
  0xe9   :  { %v3208_v29 = vadd.f32 %v129_v28, %v40_v26  ;;  %v199_v26 = vld [vmem:[%s4117_s4 + $0xd0] sm:$0xff]  ;;  %v204_v28 = vld [vmem:[%s4117_s4 + $0xf8] sm:$0xff] }
  0xea   :  { %v2359_v34 = vmul.f32 -1.442695, %v132_v33  ;;  %v201_v33 = vld [vmem:[%s4117_s4 + $0xe0] sm:$0xff] }
  0xeb   :  { %2869 = vtanh.f32 %v3208_v29 }
  0xec   :  { %2871 = vpow2.f32 %v2359_v34  ;;  %v203_v34 = vld [vmem:[%s4117_s4 + $0xf0] sm:$0xff] }
  0xf5   :  { %v2870_v30 = vpop.eup %2869 }
  0xf6   :  { %153 = vrot.lane.b32.xlu0 %v2870_v30, %s3062_s29  ;;  %v2872_v35 = vpop.eup %2871  ;;  %v3356_v30 = vpack.c.bf16 %v199_v26, %v197_v25 }
  0xf7   :  { %v140_v36 = vadd.f32 1.0, %v2872_v35 }
  0xf8   :  { %2510 = vmatpush1.bf16.msra.mxu1 %v3356_v30 }
  0xf9   :  { %2873 = vrcp.f32 %v140_v36  ;;  %v3370_v36 = vpack.c.bf16 %v203_v34, %v201_v33 }
  0xfa   :  { %148 = vrot.lane.b32.xlu0 %v35_v31, %s3062_s29  ;;  %v3359_v31 = vpack.c.bf16 %v204_v28, %v202_v27 }
  0xfc   :  { %2512 = vmatprep.subr.bf16.mxu1 %v3359_v31 }
  0xfd   :  { %2514 = vmatpush1.bf16.msra.mxu1 %v3370_v36 }
  0xfe   :  { %169 = vrot.lane.b32.xlu0 %v2356_v40, %s3062_s29  ;;  %2564 = vmatprep.subr.bf16.mxu1 %v3129_v4  ;;  %v2357_v40 = vld [vmem:[%s4116_s2 + $0x8] sm:$0xff] }
 0x102   :  { %301 = vrot.lane.b32.xlu0 %v2357_v40, %s3062_s29 }
 0x103   :  { %v3219_v37 = vpop.eup %2873 }
 0x168   :  { %v154_v38 = vpop.permute.xlu0 %153 }
 0x169   :  { %v156_v39 = vmul.f32 %v3219_v37, %v154_v38 }
 0x16b   :  { %158 = vrot.lane.b32.xlu1 %v156_v39, %s3062_s29 }
 0x16c   :  { %v149_v32 = vpop.permute.xlu0 %148 }
 0x16d   :  { %v151_v35 = vmul.f32 %v3219_v37, %v149_v32  ;;  %v2360_v37 = vmul.f32 -1.442695, %v3208_v29  ;;  %v206_v29 = vlaneseq }
 0x16f   :  { %v207_v52 = vshrl.u32 %v206_v29, 7 }
 0x170   :  { %v170_v47 = vpop.permute.xlu0 %169 }
 0x171   :  { %v208_v53 = vsub.s32 0, %v207_v52  ;;  %v212_v57 = vsub.s32 1, %v207_v52 }
 0x1dd   :  { %v159_v38 = vpop.permute.xlu1 %158 }
 0x1de   :  { %v3372_v39 = vadd.f32 %v159_v38, %v151_v35 }
 0x1e0   :  { %2875 = vtanh.f32 %v3372_v39 }
 0x1e1   :  { %2877 = vpow2.f32 %v2360_v37 }
 0x1ea   :  { %v2876_v41 = vpop.eup %2875 }
 0x1eb   :  { %164 = vrot.lane.b32.xlu1 %v2876_v41, %s3062_s29  ;;  %v2878_v42 = vpop.eup %2877  ;;  %v302_v41 = vpop.permute.xlu0 %301 }
 0x1ec   :  { %v141_v43 = vadd.f32 1.0, %v2878_v42 }
 0x1ee   :  { %2879 = vrcp.f32 %v141_v43 }
 0x1f8   :  { %v2880_v45 = vpop.eup %2879 }
 0x25d   :  { %v165_v46 = vpop.permute.xlu1 %164 }
 0x25e   :  { %v167_v50 = vmul.f32 %v2880_v45, %v165_v46 }
 0x260   :  { %2365 = vmatmul.mubr.msk.f32.vlgmr.msra.gmra.mrb[2].mxu0 %vm57_vm0, %v167_v50  ;;  %v172_v51 = vsel %vm57_vm0, %v167_v50, %v170_v47 }
 0x261   :  { %281 = vmatmul.mubr.f32.vlgmr.msra.gmra.mrb[0].mxu1 %v172_v51  ;;  %2534 = vmatpush1.bf16.msra.mxu0 %v3247_v48 }
 0x262   :  { %2566 = vmatpush1.bf16.msra.mxu1 %v3140_v8  ;;  %672 = vmatprep.mubr.f32.mxu1 %v3061_v3 }
 0x263   :  { %2568 = vmatprep.subr.bf16.mxu1 %v3142_v9  ;;  %2536 = vmatprep.subr.bf16.mxu0 %v3249_v49 }
 0x264   :  { %548 = vmatprep.mubr.f32.mxu0 %v3061_v3 }
 0x265   :  { %2538 = vmatpush1.bf16.msra.mxu0 %v3266_v54 }
 0x266   :  { %2570 = vmatpush1.bf16.msra.mxu1 %v3158_v14  ;;  %2540 = vmatprep.subr.bf16.mxu0 %v3269_v55 }
 0x267   :  { %2572 = vmatprep.subr.bf16.mxu1 %v3161_v15 }
 0x269   :  { %2542 = vmatpush1.bf16.msra.mxu0 %v3284_v60 }
 0x26a   :  { %2574 = vmatpush1.bf16.msra.mxu1 %v3176_v20  ;;  %2544 = vmatprep.subr.bf16.mxu0 %v3287_v61 }
 0x26b   :  { %2576 = vmatprep.subr.bf16.mxu1 %v3179_v21 }
 0x26d   :  { %2546 = vmatpush1.bf16.msra.mxu0 %v3302_v2 }
 0x26e   :  { %2578 = vmatpush1.bf16.msra.mxu1 %v3188_v24  ;;  %2548 = vmatprep.subr.bf16.mxu0 %v3305_v5 }
 0x26f   :  { %2580 = vmatprep.subr.bf16.mxu1 %v3236_v44  ;;  %v38_v44 = vld [vmem:[%s4118_s5] sm:$0x3] }
 0x270   :  { %v3414_v56 = vrot.slane %v38_v44, %v208_v53  ;;  %v3416_v63 = vrot.slane %v38_v44, %v212_v57 }
 0x271   :  { %2550 = vmatpush1.bf16.msra.mxu0 %v3320_v12 }
 0x272   :  { %2552 = vmatprep.subr.bf16.mxu0 %v3323_v13 }
 0x275   :  { %2554 = vmatpush1.bf16.msra.mxu0 %v3338_v22 }
 0x276   :  { %2556 = vmatprep.subr.bf16.mxu0 %v3341_v23 }
 0x279   :  { %2558 = vmatpush1.bf16.msra.mxu0 %v3356_v30 }
 0x27a   :  { %2560 = vmatprep.subr.bf16.mxu0 %v3359_v31 }
 0x27d   :  { %2562 = vmatpush1.bf16.msra.mxu0 %v3370_v36 }
 0x27e   :  { %2612 = vmatprep.subr.bf16.mxu0 %v3129_v4  ;;  %v2364_v4 = vld [vmem:[%s4115_s0 + $0x18] sm:$0xff] }
 0x333   :  { %v410_v58 = vpop.f32.mrb[2].mxu0 }
 0x334   :  { %v282_v59 = vpop.f32.mrb[0].mxu1  ;;  %v412_v62 = vpop.f32.mrb[3].mxu0  ;;  %v415_v17 = vadd.f32 %v2363_v16, %v410_v58 }
 0x335   :  { %v284_v0 = vpop.f32.mrb[1].mxu1  ;;  %v416_v6 = vadd.f32 %v2364_v4, %v412_v62  ;;  %v283_v11 = vadd.f32 %v282_v59, %v3414_v56 }
 0x336   :  { %v285_v1 = vadd.f32 %v284_v0, %v3416_v63  ;;  %v2366_v19 = vmul.f32 -1.442695, %v415_v17 }
 0x337   :  { %v2361_v18 = vmul.f32 -1.442695, %v283_v11  ;;  %v2367_v52 = vmul.f32 -1.442695, %v416_v6 }
 0x338   :  { %2881 = vtanh.f32 %v285_v1  ;;  %v2362_v29 = vmul.f32 -1.442695, %v285_v1 }
 0x339   :  { %2883 = vtanh.f32 %v416_v6 }
 0x33a   :  { %2885 = vpow2.f32 %v2361_v18 }
 0x33b   :  { %2887 = vpow2.f32 %v2366_v19 }
 0x342   :  { %v2882_v7 = vpop.eup %2881 }
 0x343   :  { %306 = vrot.lane.b32.xlu1 %v2882_v7, %s3062_s29  ;;  %v2884_v10 = vpop.eup %2883 }
 0x344   :  { %v2886_v25 = vpop.eup %2885 }
 0x345   :  { %v293_v26 = vadd.f32 1.0, %v2886_v25  ;;  %v2888_v27 = vpop.eup %2887 }
 0x346   :  { %v423_v28 = vadd.f32 1.0, %v2888_v27 }
 0x347   :  { %432 = vrot.lane.b32.xlu1 %v2884_v10, %s3062_s29  ;;  %2889 = vrcp.f32 %v293_v26 }
 0x348   :  { %2891 = vrcp.f32 %v423_v28 }
 0x351   :  { %v2890_v32 = vpop.eup %2889 }
 0x352   :  { %v2892_v35 = vpop.eup %2891  ;;  %v304_v37 = vmul.f32 %v2890_v32, %v302_v41 }
 0x353   :  { %v430_v45 = vmul.f32 %v2892_v35, %v3372_v39 }
 0x3b5   :  { %v307_v33 = vpop.permute.xlu1 %306 }
 0x3b6   :  { %v309_v34 = vmul.f32 %v2890_v32, %v307_v33 }
 0x3b8   :  { %311 = vrot.lane.b32.xlu0 %v309_v34, %s3062_s29 }
 0x3b9   :  { %v433_v38 = vpop.permute.xlu1 %432 }
 0x3ba   :  { %v435_v40 = vmul.f32 %v2892_v35, %v433_v38 }
 0x3bc   :  { %437 = vrot.lane.b32.xlu1 %v435_v40, %s3062_s29 }
 0x42a   :  { %v312_v42 = vpop.permute.xlu0 %311 }
 0x42b   :  { %v3430_v43 = vadd.f32 %v312_v42, %v304_v37 }
 0x42d   :  { %2893 = vtanh.f32 %v3430_v43 }
 0x42e   :  { %v438_v46 = vpop.permute.xlu1 %437 }
 0x42f   :  { %v3434_v47 = vadd.f32 %v438_v46, %v430_v45 }
 0x431   :  { %2895 = vtanh.f32 %v3434_v47 }
 0x432   :  { %2897 = vpow2.f32 %v2362_v29 }
 0x433   :  { %2899 = vpow2.f32 %v2367_v52 }
 0x437   :  { %v2894_v50 = vpop.eup %2893 }
 0x438   :  { %317 = vrot.lane.b32.xlu0 %v2894_v50, %s3062_s29 }
 0x43b   :  { %v2896_v51 = vpop.eup %2895 }
 0x43c   :  { %443 = vrot.lane.b32.xlu1 %v2896_v51, %s3062_s29  ;;  %v2898_v53 = vpop.eup %2897 }
 0x43d   :  { %v294_v44 = vadd.f32 1.0, %v2898_v53  ;;  %v2900_v57 = vpop.eup %2899  ;;  %v2378_v53 = vld [vmem:[%s4115_s0 + $0x38] sm:$0xff] }
 0x43e   :  { %v424_v58 = vadd.f32 1.0, %v2900_v57 }
 0x43f   :  { %2901 = vrcp.f32 %v294_v44 }
 0x440   :  { %2903 = vrcp.f32 %v424_v58 }
 0x449   :  { %v2902_v39 = vpop.eup %2901 }
 0x44a   :  { %v2904_v0 = vpop.eup %2903 }
 0x4aa   :  { %v318_v59 = vpop.permute.xlu0 %317 }
 0x4ab   :  { %v320_v62 = vmul.f32 %v2902_v39, %v318_v59 }
 0x4ad   :  { %321 = vst.msk [vmem:[#allocation2] sm:$0xff] %vm57_vm0, %v320_v62  ;;  %448 = vrot.lane.b32.xlu0 %v320_v62, %s3062_s29 }
 0x4ae   :  { %v444_v4 = vpop.permute.xlu1 %443 }
 0x4af   :  { %v446_v7 = vmul.f32 %v2904_v0, %v444_v4  ;;  %v2377_v0 = vld [vmem:[%s4115_s0 + $0x30] sm:$0xff] }
 0x4b1   :  { %2372 = vmatmul.mubr.msk.f32.vlgmr.msra.gmra.mrb[2].mxu1 %vm57_vm0, %v446_v7 }
 0x4b2   :  { %2582 = vmatpush1.bf16.msra.mxu1 %v3247_v48  ;;  %812 = vmatprep.mubr.f32.mxu1 %v3061_v3 }
 0x4b3   :  { %2584 = vmatprep.subr.bf16.mxu1 %v3249_v49 }
 0x4b6   :  { %2586 = vmatpush1.bf16.msra.mxu1 %v3266_v54  ;;  %v2371_v54 = vld [vmem:[%s4115_s0 + $0x28] sm:$0xff] }
 0x4b7   :  { %2588 = vmatprep.subr.bf16.mxu1 %v3269_v55 }
 0x4ba   :  { %2590 = vmatpush1.bf16.msra.mxu1 %v3284_v60 }
 0x4bb   :  { %2592 = vmatprep.subr.bf16.mxu1 %v3287_v61 }
 0x4be   :  { %2594 = vmatpush1.bf16.msra.mxu1 %v3302_v2 }
 0x4bf   :  { %2596 = vmatprep.subr.bf16.mxu1 %v3305_v5 }
 0x4c2   :  { %2598 = vmatpush1.bf16.msra.mxu1 %v3320_v12 }
 0x4c3   :  { %2600 = vmatprep.subr.bf16.mxu1 %v3323_v13 }
 0x4c6   :  { %2602 = vmatpush1.bf16.msra.mxu1 %v3338_v22 }
 0x4c7   :  { %2604 = vmatprep.subr.bf16.mxu1 %v3341_v23 }
 0x4ca   :  { %2606 = vmatpush1.bf16.msra.mxu1 %v3356_v30 }
 0x4cb   :  { %2608 = vmatprep.subr.bf16.mxu1 %v3359_v31 }
 0x4ce   :  { %2610 = vmatpush1.bf16.msra.mxu1 %v3370_v36 }
 0x51f   :  { %v449_v48 = vpop.permute.xlu0 %448 }
 0x520   :  { %v451_v49 = vsel %vm57_vm0, %v446_v7, %v449_v48 }
 0x521   :  { %549 = vmatmul.mubr.f32.vlgmr.msra.gmra.mrb[4].mxu0 %v451_v49 }
 0x522   :  { %2614 = vmatpush1.bf16.msra.mxu0 %v3140_v8  ;;  %936 = vmatprep.mubr.f32.mxu0 %v3061_v3 }
 0x523   :  { %2616 = vmatprep.subr.bf16.mxu0 %v3142_v9  ;;  %v2370_v9 = vld [vmem:[%s4115_s0 + $0x20] sm:$0xff] }
 0x526   :  { %2618 = vmatpush1.bf16.msra.mxu0 %v3158_v14 }
 0x527   :  { %2620 = vmatprep.subr.bf16.mxu0 %v3161_v15 }
 0x52a   :  { %2622 = vmatpush1.bf16.msra.mxu0 %v3176_v20 }
 0x52b   :  { %2624 = vmatprep.subr.bf16.mxu0 %v3179_v21 }
 0x52e   :  { %2626 = vmatpush1.bf16.msra.mxu0 %v3188_v24 }
 0x584   :  { %v674_v55 = vpop.f32.mrb[2].mxu1 }
 0x585   :  { %v676_v8 = vpop.f32.mrb[3].mxu1  ;;  %v679_v14 = vadd.f32 %v2370_v9, %v674_v55 }
 0x586   :  { %v680_v60 = vadd.f32 %v2371_v54, %v676_v8 }
 0x587   :  { %v2373_v15 = vmul.f32 -1.442695, %v679_v14  ;;  %v1118_v14 = vld [vmem:[%s4113_s3 + $0x8] sm:$0xff] }
 0x588   :  { %2905 = vtanh.f32 %v680_v60  ;;  %v2374_v33 = vmul.f32 -1.442695, %v680_v60 }
 0x589   :  { %2907 = vpow2.f32 %v2373_v15  ;;  %v1120_v15 = vld [vmem:[%s4113_s3 + $0x18] sm:$0xff] }
 0x592   :  { %v2906_v61 = vpop.eup %2905 }
 0x593   :  { %696 = vrot.lane.b32.xlu0 %v2906_v61, %s3062_s29  ;;  %v2908_v20 = vpop.eup %2907 }
 0x594   :  { %v687_v5 = vadd.f32 1.0, %v2908_v20  ;;  %v3515_v20 = vpack.c.bf16 %v1120_v15, %v1118_v14  ;;  %v986_v14 = vld [vmem:[%s4117_s4 + $0x30] sm:$0xff]  ;;  %v989_v15 = vld [vmem:[%s4117_s4 + $0x48] sm:$0xff] }
 0x596   :  { %2660 = vmatprep.subr.bf16.mxu1 %v3515_v20 }
 0x5f4   :  { %v550_v21 = vpop.f32.mrb[4].mxu0 }
 0x5f5   :  { %v552_v24 = vpop.f32.mrb[5].mxu0  ;;  %v551_v10 = vadd.f32 %v550_v21, %v3414_v56  ;;  %v1117_v21 = vld [vmem:[%s4113_s3] sm:$0xff] }
 0x5f6   :  { %v553_v2 = vadd.f32 %v552_v24, %v3416_v63  ;;  %v1119_v24 = vld [vmem:[%s4113_s3 + $0x10] sm:$0xff] }
 0x5f7   :  { %v2368_v11 = vmul.f32 -1.442695, %v551_v10  ;;  %v1126_v10 = vld [vmem:[%s4113_s3 + $0x48] sm:$0xff] }
 0x5f8   :  { %2909 = vtanh.f32 %v553_v2 }
 0x5f9   :  { %2911 = vrcp.f32 %v687_v5  ;;  %v1122_v5 = vld [vmem:[%s4113_s3 + $0x28] sm:$0xff] }
 0x5fa   :  { %2913 = vpow2.f32 %v2368_v11  ;;  %v1128_v11 = vld [vmem:[%s4113_s3 + $0x58] sm:$0xff] }
 0x602   :  { %v2910_v12 = vpop.eup %2909 }
 0x603   :  { %570 = vrot.lane.b32.xlu1 %v2910_v12, %s3062_s29  ;;  %v2912_v13 = vpop.eup %2911  ;;  %v1124_v12 = vld [vmem:[%s4113_s3 + $0x38] sm:$0xff] }
 0x604   :  { %v2914_v16 = vpop.eup %2913  ;;  %v694_v26 = vmul.f32 %v2912_v13, %v3434_v47  ;;  %v2369_v47 = vmul.f32 -1.442695, %v553_v2  ;;  %v3524_v2 = vpack.c.bf16 %v1119_v24, %v1117_v21  ;;  %v991_v21 = vld [vmem:[%s4117_s4 + $0x58] sm:$0xff] }
 0x605   :  { %v697_v1 = vpop.permute.xlu0 %696  ;;  %v561_v17 = vadd.f32 1.0, %v2914_v16 }
 0x606   :  { %v699_v6 = vmul.f32 %v2912_v13, %v697_v1  ;;  %v1121_v13 = vld [vmem:[%s4113_s3 + $0x20] sm:$0xff]  ;;  %v3536_v1 = vpack.c.bf16 %v1124_v12, %v1122_v5  ;;  %v3643_v5 = vpack.c.bf16 %v991_v21, %v989_v15 }
 0x607   :  { %2915 = vrcp.f32 %v561_v17  ;;  %v3551_v17 = vpack.c.bf16 %v1128_v11, %v1126_v10  ;;  %v988_v12 = vld [vmem:[%s4117_s4 + $0x40] sm:$0xff]  ;;  %v993_v10 = vld [vmem:[%s4117_s4 + $0x68] sm:$0xff]  ;;  %v995_v11 = vld [vmem:[%s4117_s4 + $0x78] sm:$0xff] }
 0x608   :  { %701 = vrot.lane.b32.xlu0 %v699_v6, %s3062_s29  ;;  %v1123_v6 = vld [vmem:[%s4113_s3 + $0x30] sm:$0xff] }
 0x609   :  { %v3548_v16 = vpack.c.bf16 %v1123_v6, %v1121_v13  ;;  %v990_v13 = vld [vmem:[%s4117_s4 + $0x50] sm:$0xff] }
 0x611   :  { %v2916_v18 = vpop.eup %2915 }
 0x612   :  { %v568_v35 = vmul.f32 %v2916_v18, %v3430_v43 }
 0x675   :  { %v571_v19 = vpop.permute.xlu1 %570 }
 0x676   :  { %v573_v25 = vmul.f32 %v2916_v18, %v571_v19  ;;  %v1125_v18 = vld [vmem:[%s4113_s3 + $0x40] sm:$0xff]  ;;  %v1127_v19 = vld [vmem:[%s4113_s3 + $0x50] sm:$0xff] }
 0x678   :  { %575 = vrot.lane.b32.xlu1 %v573_v25, %s3062_s29  ;;  %v1130_v25 = vld [vmem:[%s4113_s3 + $0x68] sm:$0xff] }
 0x67a   :  { %v702_v27 = vpop.permute.xlu0 %701 }
 0x67b   :  { %v3480_v28 = vadd.f32 %v702_v27, %v694_v26  ;;  %v1132_v26 = vld [vmem:[%s4113_s3 + $0x78] sm:$0xff]  ;;  %v3566_v27 = vpack.c.bf16 %v1127_v19, %v1125_v18  ;;  %v3660_v18 = vpack.c.bf16 %v990_v13, %v988_v12  ;;  %v3664_v19 = vpack.c.bf16 %v995_v11, %v993_v10 }
 0x67d   :  { %2917 = vtanh.f32 %v3480_v28 }
 0x67e   :  { %2919 = vpow2.f32 %v2374_v33 }
 0x687   :  { %v2918_v32 = vpop.eup %2917 }
 0x688   :  { %707 = vrot.lane.b32.xlu0 %v2918_v32, %s3062_s29  ;;  %v2920_v34 = vpop.eup %2919  ;;  %v3569_v32 = vpack.c.bf16 %v1132_v26, %v1130_v25  ;;  %v992_v25 = vld [vmem:[%s4117_s4 + $0x60] sm:$0xff]  ;;  %v994_v26 = vld [vmem:[%s4117_s4 + $0x70] sm:$0xff] }
 0x689   :  { %v688_v41 = vadd.f32 1.0, %v2920_v34  ;;  %v1129_v34 = vld [vmem:[%s4113_s3 + $0x60] sm:$0xff] }
 0x6ea   :  { %v576_v38 = vpop.permute.xlu1 %575 }
 0x6eb   :  { %v3485_v40 = vadd.f32 %v576_v38, %v568_v35  ;;  %v1131_v35 = vld [vmem:[%s4113_s3 + $0x70] sm:$0xff] }
 0x6ec   :  { %v3580_v38 = vpack.c.bf16 %v1131_v35, %v1129_v34  ;;  %v999_v34 = vld [vmem:[%s4117_s4 + $0x98] sm:$0xff]  ;;  %v3680_v35 = vpack.c.bf16 %v994_v26, %v992_v25 }
 0x6ed   :  { %2921 = vtanh.f32 %v3485_v40 }
 0x6ee   :  { %2923 = vrcp.f32 %v688_v41 }
 0x6ef   :  { %2925 = vpow2.f32 %v2369_v47 }
 0x6f7   :  { %v2922_v37 = vpop.eup %2921 }
 0x6f8   :  { %581 = vrot.lane.b32.xlu1 %v2922_v37, %s3062_s29  ;;  %v2924_v42 = vpop.eup %2923 }
 0x6f9   :  { %v2926_v43 = vpop.eup %2925 }
 0x6fa   :  { %v708_v45 = vpop.permute.xlu0 %707  ;;  %v562_v50 = vadd.f32 1.0, %v2926_v43 }
 0x6fb   :  { %v710_v46 = vmul.f32 %v2924_v42, %v708_v45 }
 0x6fc   :  { %2927 = vrcp.f32 %v562_v50 }
 0x6fd   :  { %2379 = vmatmul.mubr.msk.f32.vlgmr.msra.gmra.mrb[6].mxu0 %vm57_vm0, %v710_v46 }
 0x6fe   :  { %1076 = vmatprep.mubr.f32.mxu0 %v3061_v3 }
 0x706   :  { %v2928_v51 = vpop.eup %2927 }
 0x76a   :  { %v582_v29 = vpop.permute.xlu1 %581 }
 0x76b   :  { %v584_v52 = vmul.f32 %v2928_v51, %v582_v29 }
 0x76d   :  { %585 = vst.msk [vmem:[#allocation2 + $0x8] sm:$0xff] %vm57_vm0, %v584_v52  ;;  %712 = vrot.lane.b32.xlu1 %v584_v52, %s3062_s29 }
 0x7d0   :  { %v938_v44 = vpop.f32.mrb[6].mxu0 }
 0x7d1   :  { %v940_v57 = vpop.f32.mrb[7].mxu0  ;;  %v943_v4 = vadd.f32 %v2377_v0, %v938_v44 }
 0x7d2   :  { %v3496_v58 = vadd.f32 %v2378_v53, %v940_v57 }
 0x7d3   :  { %v2380_v7 = vmul.f32 -1.442695, %v943_v4  ;;  %v981_v4 = vld [vmem:[%s4117_s4 + $0x8] sm:$0xff] }
 0x7d4   :  { %2929 = vtanh.f32 %v3496_v58  ;;  %v2381_v50 = vmul.f32 -1.442695, %v3496_v58 }
 0x7d5   :  { %2931 = vpow2.f32 %v2380_v7  ;;  %v983_v7 = vld [vmem:[%s4117_s4 + $0x18] sm:$0xff] }
 0x7de   :  { %v2930_v39 = vpop.eup %2929 }
 0x7df   :  { %v713_v59 = vpop.permute.xlu1 %712  ;;  %960 = vrot.lane.b32.xlu1 %v2930_v39, %s3062_s29  ;;  %v2932_v48 = vpop.eup %2931 }
 0x7e0   :  { %v715_v62 = vsel %vm57_vm0, %v710_v46, %v713_v59  ;;  %v951_v49 = vadd.f32 1.0, %v2932_v48  ;;  %v980_v48 = vld [vmem:[%s4117_s4] sm:$0xff] }
 0x7e1   :  { %813 = vmatmul.mubr.f32.vlgmr.msra.gmra.mrb[4].mxu1 %v715_v62 }
 0x7e2   :  { %1200 = vmatprep.mubr.f32.mxu1 %v3061_v3  ;;  %2933 = vrcp.f32 %v951_v49  ;;  %2662 = vmatpush1.bf16.msra.mxu1 %v3524_v2  ;;  %v3609_v49 = vpack.c.bf16 %v983_v7, %v981_v4 }
 0x7e3   :  { %2664 = vmatprep.subr.bf16.mxu1 %v3536_v1 }
 0x7e4   :  { %2628 = vmatprep.subr.bf16.mxu0 %v3609_v49 }
 0x7e6   :  { %2666 = vmatpush1.bf16.msra.mxu1 %v3548_v16 }
 0x7e7   :  { %2668 = vmatprep.subr.bf16.mxu1 %v3551_v17 }
 0x7ea   :  { %2670 = vmatpush1.bf16.msra.mxu1 %v3566_v27 }
 0x7eb   :  { %2672 = vmatprep.subr.bf16.mxu1 %v3569_v32 }
 0x7ec   :  { %v2934_v54 = vpop.eup %2933 }
 0x7ed   :  { %v958_v41 = vmul.f32 %v2934_v54, %v3480_v28 }
 0x7ee   :  { %2674 = vmatpush1.bf16.msra.mxu1 %v3580_v38 }
 0x7ef   :  { %2676 = vmatprep.subr.bf16.mxu1 %v3609_v49 }
 0x851   :  { %v961_v55 = vpop.permute.xlu1 %960 }
 0x852   :  { %v963_v8 = vmul.f32 %v2934_v54, %v961_v55  ;;  %v985_v54 = vld [vmem:[%s4117_s4 + $0x28] sm:$0xff]  ;;  %v987_v55 = vld [vmem:[%s4117_s4 + $0x38] sm:$0xff] }
 0x854   :  { %965 = vrot.lane.b32.xlu1 %v963_v8, %s3062_s29 }
 0x8b4   :  { %v814_v60 = vpop.f32.mrb[4].mxu1 }
 0x8b5   :  { %v816_v61 = vpop.f32.mrb[5].mxu1  ;;  %v815_v46 = vadd.f32 %v814_v60, %v3414_v56  ;;  %v3622_v60 = vpack.c.bf16 %v987_v55, %v985_v54 }
 0x8b6   :  { %v3507_v9 = vadd.f32 %v816_v61, %v3416_v63  ;;  %v984_v61 = vld [vmem:[%s4117_s4 + $0x20] sm:$0xff] }
 0x8b7   :  { %v2375_v47 = vmul.f32 -1.442695, %v815_v46  ;;  %v3639_v24 = vpack.c.bf16 %v986_v14, %v984_v61  ;;  %v1001_v46 = vld [vmem:[%s4117_s4 + $0xa8] sm:$0xff] }
 0x8b8   :  { %2935 = vtanh.f32 %v3507_v9 }
 0x8c2   :  { %v2936_v33 = vpop.eup %2935 }
 0x8c3   :  { %834 = vrot.lane.b32.xlu0 %v2936_v33, %s3062_s29  ;;  %v997_v33 = vld [vmem:[%s4117_s4 + $0x88] sm:$0xff] }
 0x8c6   :  { %v966_v37 = vpop.permute.xlu1 %965 }
 0x8c7   :  { %v3584_v42 = vadd.f32 %v966_v37, %v958_v41  ;;  %v3684_v41 = vpack.c.bf16 %v999_v34, %v997_v33  ;;  %v996_v37 = vld [vmem:[%s4117_s4 + $0x80] sm:$0xff] }
 0x8c9   :  { %2937 = vtanh.f32 %v3584_v42 }
 0x8ca   :  { %2939 = vpow2.f32 %v2375_v47  ;;  %v1003_v47 = vld [vmem:[%s4117_s4 + $0xb8] sm:$0xff] }
 0x8cb   :  { %2941 = vpow2.f32 %v2381_v50  ;;  %v3704_v50 = vpack.c.bf16 %v1003_v47, %v1001_v46 }
 0x8d3   :  { %v2938_v45 = vpop.eup %2937 }
 0x8d4   :  { %971 = vrot.lane.b32.xlu1 %v2938_v45, %s3062_s29  ;;  %v2940_v43 = vpop.eup %2939  ;;  %v998_v45 = vld [vmem:[%s4117_s4 + $0x90] sm:$0xff] }
 0x8d5   :  { %v825_v51 = vadd.f32 1.0, %v2940_v43  ;;  %v2942_v28 = vpop.eup %2941  ;;  %v3700_v43 = vpack.c.bf16 %v998_v45, %v996_v37 }
 0x8d6   :  { %v952_v44 = vadd.f32 1.0, %v2942_v28 }
 0x8d7   :  { %2943 = vrcp.f32 %v825_v51  ;;  %v2376_v51 = vmul.f32 -1.442695, %v3507_v9  ;;  %v2384_v9 = vld [vmem:[%s4115_s0 + $0x40] sm:$0xff] }
 0x8d8   :  { %2945 = vrcp.f32 %v952_v44 }
 0x8e1   :  { %v2944_v29 = vpop.eup %2943 }
 0x8e2   :  { %v2946_v57 = vpop.eup %2945  ;;  %v832_v58 = vmul.f32 %v2944_v29, %v3485_v40  ;;  %v982_v40 = vld [vmem:[%s4117_s4 + $0x10] sm:$0xff] }
 0x8e3   :  { %v3620_v8 = vpack.c.bf16 %v982_v40, %v980_v48 }
 0x8e5   :  { %2630 = vmatpush1.bf16.msra.mxu0 %v3620_v8 }
 0x8e6   :  { %2632 = vmatprep.subr.bf16.mxu0 %v3622_v60 }
 0x8e9   :  { %2634 = vmatpush1.bf16.msra.mxu0 %v3639_v24 }
 0x8ea   :  { %2636 = vmatprep.subr.bf16.mxu0 %v3643_v5 }
 0x8ed   :  { %2638 = vmatpush1.bf16.msra.mxu0 %v3660_v18 }
 0x8ee   :  { %2640 = vmatprep.subr.bf16.mxu0 %v3664_v19 }
 0x8f1   :  { %2642 = vmatpush1.bf16.msra.mxu0 %v3680_v35 }
 0x8f2   :  { %2644 = vmatprep.subr.bf16.mxu0 %v3684_v41 }
 0x8f5   :  { %2646 = vmatpush1.bf16.msra.mxu0 %v3700_v43 }
 0x8f6   :  { %2648 = vmatprep.subr.bf16.mxu0 %v3704_v50 }
 0x8f9   :  { %2650 = vmatpush1.bf16.msra.mxu0 %v3338_v22  ;;  %v2385_v22 = vld [vmem:[%s4115_s0 + $0x48] sm:$0xff] }
 0x8fa   :  { %2652 = vmatprep.subr.bf16.mxu0 %v3341_v23 }
 0x8fd   :  { %2654 = vmatpush1.bf16.msra.mxu0 %v3356_v30 }
 0x8fe   :  { %2656 = vmatprep.subr.bf16.mxu0 %v3359_v31 }
 0x901   :  { %2658 = vmatpush1.bf16.msra.mxu0 %v3370_v36 }
 0x902   :  { %2708 = vmatprep.subr.bf16.mxu0 %v3515_v20 }
 0x935   :  { %v835_v52 = vpop.permute.xlu0 %834 }
 0x936   :  { %v837_v53 = vmul.f32 %v2944_v29, %v835_v52 }
 0x938   :  { %839 = vrot.lane.b32.xlu0 %v837_v53, %s3062_s29 }
 0x946   :  { %v972_v39 = vpop.permute.xlu1 %971 }
 0x947   :  { %v3591_v59 = vmul.f32 %v2946_v57, %v972_v39 }
 0x949   :  { %2386 = vmatmul.mubr.msk.f32.vlgmr.msra.gmra.mrb[6].mxu1 %vm57_vm0, %v3591_v59 }
 0x94a   :  { %1340 = vmatprep.mubr.f32.mxu1 %v3061_v3  ;;  %2678 = vmatpush1.bf16.msra.mxu1 %v3620_v8 }
 0x94b   :  { %2680 = vmatprep.subr.bf16.mxu1 %v3622_v60 }
 0x94e   :  { %2682 = vmatpush1.bf16.msra.mxu1 %v3639_v24 }
 0x94f   :  { %2684 = vmatprep.subr.bf16.mxu1 %v3643_v5 }
 0x952   :  { %2686 = vmatpush1.bf16.msra.mxu1 %v3660_v18 }
 0x953   :  { %2688 = vmatprep.subr.bf16.mxu1 %v3664_v19 }
 0x956   :  { %2690 = vmatpush1.bf16.msra.mxu1 %v3680_v35 }
 0x957   :  { %2692 = vmatprep.subr.bf16.mxu1 %v3684_v41 }
 0x95a   :  { %2694 = vmatpush1.bf16.msra.mxu1 %v3700_v43 }
 0x95b   :  { %2696 = vmatprep.subr.bf16.mxu1 %v3704_v50 }
 0x9aa   :  { %v840_v62 = vpop.permute.xlu0 %839 }
 0x9ab   :  { %v3597_v0 = vadd.f32 %v840_v62, %v832_v58 }
 0x9ad   :  { %2947 = vtanh.f32 %v3597_v0 }
 0x9ae   :  { %2949 = vpow2.f32 %v2376_v51 }
 0x9b7   :  { %v2948_v6 = vpop.eup %2947 }
 0x9b8   :  { %845 = vrot.lane.b32.xlu0 %v2948_v6, %s3062_s29  ;;  %v2950_v28 = vpop.eup %2949 }
 0x9b9   :  { %v826_v29 = vadd.f32 1.0, %v2950_v28 }
 0x9bb   :  { %2951 = vrcp.f32 %v826_v29 }
 0x9c5   :  { %v2952_v30 = vpop.eup %2951 }
 0xa1c   :  { %v1202_v52 = vpop.f32.mrb[6].mxu1 }
 0xa1d   :  { %v1204_v53 = vpop.f32.mrb[7].mxu1  ;;  %v1207_v57 = vadd.f32 %v2384_v9, %v1202_v52  ;;  %v1270_v9 = vld [vmem:[%s4117_s4 + $0xd0] sm:$0xff] }
 0xa1e   :  { %v1208_v23 = vadd.f32 %v2385_v22, %v1204_v53 }
 0xa1f   :  { %v2387_v39 = vmul.f32 -1.442695, %v1207_v57 }
 0xa20   :  { %2953 = vtanh.f32 %v1208_v23  ;;  %v2388_v13 = vmul.f32 -1.442695, %v1208_v23  ;;  %v1264_v23 = vld [vmem:[%s4117_s4 + $0xa0] sm:$0xff] }
 0xa21   :  { %2955 = vpow2.f32 %v2387_v39  ;;  %v1273_v39 = vld [vmem:[%s4117_s4 + $0xe8] sm:$0xff] }
 0xa2a   :  { %v846_v31 = vpop.permute.xlu0 %845  ;;  %v2954_v36 = vpop.eup %2953 }
 0xa2b   :  { %v848_v44 = vmul.f32 %v2952_v30, %v846_v31  ;;  %v2956_v58 = vpop.eup %2955  ;;  %v1266_v30 = vld [vmem:[%s4117_s4 + $0xb0] sm:$0xff]  ;;  %v1269_v31 = vld [vmem:[%s4117_s4 + $0xc8] sm:$0xff] }
 0xa2c   :  { %v1215_v62 = vadd.f32 1.0, %v2956_v58  ;;  %v1275_v58 = vld [vmem:[%s4117_s4 + $0xf8] sm:$0xff] }
 0xa2d   :  { %849 = vst.msk [vmem:[#allocation2 + $0x10] sm:$0xff] %vm57_vm0, %v848_v44  ;;  %976 = vrot.lane.b32.xlu0 %v848_v44, %s3062_s29  ;;  %v1271_v44 = vld [vmem:[%s4117_s4 + $0xd8] sm:$0xff] }
 0xa2e   :  { %2957 = vrcp.f32 %v1215_v62  ;;  %v3790_v57 = vpack.c.bf16 %v1271_v44, %v1269_v31 }
 0xa31   :  { %1224 = vrot.lane.b32.xlu0 %v2954_v36, %s3062_s29  ;;  %v1268_v36 = vld [vmem:[%s4117_s4 + $0xc0] sm:$0xff] }
 0xa32   :  { %v3799_v62 = vpack.c.bf16 %v1270_v9, %v1268_v36 }
 0xa38   :  { %v2958_v48 = vpop.eup %2957 }
 0xa9f   :  { %v977_v4 = vpop.permute.xlu0 %976 }
 0xaa0   :  { %v979_v7 = vsel %vm57_vm0, %v3591_v59, %v977_v4  ;;  %v1222_v59 = vmul.f32 %v2958_v48, %v3584_v42  ;;  %v3803_v4 = vpack.c.bf16 %v1275_v58, %v1273_v39 }
 0xaa1   :  { %1077 = vmatmul.mubr.f32.vlgmr.msra.gmra.mrb[8].mxu0 %v979_v7  ;;  %v1272_v7 = vld [vmem:[%s4117_s4 + $0xe0] sm:$0xff] }
 0xaa2   :  { %2710 = vmatpush1.bf16.msra.mxu0 %v3524_v2  ;;  %1464 = vmatprep.mubr.f32.mxu0 %v3061_v3 }
 0xaa3   :  { %v1225_v40 = vpop.permute.xlu0 %1224  ;;  %2712 = vmatprep.subr.bf16.mxu0 %v3536_v1 }
 0xaa4   :  { %v1227_v54 = vmul.f32 %v2958_v48, %v1225_v40  ;;  %v1274_v48 = vld [vmem:[%s4117_s4 + $0xf0] sm:$0xff] }
 0xaa6   :  { %1229 = vrot.lane.b32.xlu0 %v1227_v54, %s3062_s29  ;;  %2714 = vmatpush1.bf16.msra.mxu0 %v3548_v16  ;;  %v3814_v54 = vpack.c.bf16 %v1274_v48, %v1272_v7 }
 0xaa7   :  { %2716 = vmatprep.subr.bf16.mxu0 %v3551_v17 }
 0xaaa   :  { %2718 = vmatpush1.bf16.msra.mxu0 %v3566_v27 }
 0xaab   :  { %2720 = vmatprep.subr.bf16.mxu0 %v3569_v32 }
 0xaae   :  { %2722 = vmatpush1.bf16.msra.mxu0 %v3580_v38 }
 0xaaf   :  { %2724 = vmatprep.subr.bf16.mxu0 %v3609_v49 }
 0xb18   :  { %v1230_v55 = vpop.permute.xlu0 %1229 }
 0xb19   :  { %v3740_v61 = vadd.f32 %v1230_v55, %v1222_v59 }
 0xb1b   :  { %2959 = vtanh.f32 %v3740_v61 }
 0xb25   :  { %v2960_v14 = vpop.eup %2959 }
 0xb26   :  { %1235 = vrot.lane.b32.xlu0 %v2960_v14, %s3062_s29 }
 0xb74   :  { %v1078_v15 = vpop.f32.mrb[8].mxu0 }
 0xb75   :  { %v1080_v21 = vpop.f32.mrb[9].mxu0  ;;  %v1079_v33 = vadd.f32 %v1078_v15, %v3414_v56  ;;  %v2392_v15 = vld [vmem:[%s4115_s0 + $0x58] sm:$0xff] }
 0xb76   :  { %v3745_v12 = vadd.f32 %v1080_v21, %v3416_v63 }
 0xb77   :  { %v2382_v34 = vmul.f32 -1.442695, %v1079_v33 }
 0xb78   :  { %2961 = vtanh.f32 %v3745_v12  ;;  %v2383_v59 = vmul.f32 -1.442695, %v3745_v12  ;;  %v2391_v12 = vld [vmem:[%s4115_s0 + $0x50] sm:$0xff] }
 0xb79   :  { %2963 = vpow2.f32 %v2388_v13 }
 0xb82   :  { %v2962_v6 = vpop.eup %2961 }
 0xb83   :  { %1098 = vrot.lane.b32.xlu1 %v2962_v6, %s3062_s29  ;;  %v2964_v42 = vpop.eup %2963 }
 0xb84   :  { %v1216_v10 = vadd.f32 1.0, %v2964_v42 }
 0xb86   :  { %2965 = vrcp.f32 %v1216_v10 }
 0xb87   :  { %2967 = vpow2.f32 %v2382_v34 }
 0xb90   :  { %v2966_v11 = vpop.eup %2965 }
 0xb91   :  { %v2968_v37 = vpop.eup %2967 }
 0xb92   :  { %v1089_v45 = vadd.f32 1.0, %v2968_v37 }
 0xb94   :  { %2969 = vrcp.f32 %v1089_v45 }
 0xb98   :  { %v1236_v25 = vpop.permute.xlu0 %1235 }
 0xb99   :  { %v3749_v26 = vmul.f32 %v2966_v11, %v1236_v25 }
 0xb9b   :  { %2393 = vmatmul.mubr.msk.f32.vlgmr.msra.gmra.mrb[10].mxu0 %vm57_vm0, %v3749_v26 }
 0xb9c   :  { %2726 = vmatpush1.bf16.msra.mxu0 %v3620_v8  ;;  %1604 = vmatprep.mubr.f32.mxu0 %v3061_v3 }
 0xb9d   :  { %2728 = vmatprep.subr.bf16.mxu0 %v3622_v60 }
 0xb9e   :  { %v2970_v46 = vpop.eup %2969 }
 0xb9f   :  { %v1096_v28 = vmul.f32 %v2970_v46, %v3597_v0  ;;  %v3779_v0 = vpack.c.bf16 %v1266_v30, %v1264_v23 }
 0xba0   :  { %2730 = vmatpush1.bf16.msra.mxu0 %v3639_v24 }
 0xba1   :  { %2732 = vmatprep.subr.bf16.mxu0 %v3643_v5  ;;  %2698 = vmatpush1.bf16.msra.mxu1 %v3779_v0 }
 0xba2   :  { %2700 = vmatprep.subr.bf16.mxu1 %v3790_v57 }
 0xba4   :  { %2734 = vmatpush1.bf16.msra.mxu0 %v3660_v18 }
 0xba5   :  { %2736 = vmatprep.subr.bf16.mxu0 %v3664_v19  ;;  %2702 = vmatpush1.bf16.msra.mxu1 %v3799_v62 }
 0xba6   :  { %2704 = vmatprep.subr.bf16.mxu1 %v3803_v4 }
 0xba8   :  { %2738 = vmatpush1.bf16.msra.mxu0 %v3680_v35 }
 0xba9   :  { %2740 = vmatprep.subr.bf16.mxu0 %v3684_v41  ;;  %2706 = vmatpush1.bf16.msra.mxu1 %v3814_v54 }
 0xbaa   :  { %2756 = vmatprep.subr.bf16.mxu1 %v3515_v20 }
 0xbac   :  { %2742 = vmatpush1.bf16.msra.mxu0 %v3700_v43 }
 0xbad   :  { %2744 = vmatprep.subr.bf16.mxu0 %v3704_v50 }
 0xbb0   :  { %2746 = vmatpush1.bf16.msra.mxu0 %v3779_v0 }
 0xbb1   :  { %2748 = vmatprep.subr.bf16.mxu0 %v3790_v57 }
 0xbb4   :  { %2750 = vmatpush1.bf16.msra.mxu0 %v3799_v62 }
 0xbb5   :  { %2752 = vmatprep.subr.bf16.mxu0 %v3803_v4 }
 0xbb8   :  { %2754 = vmatpush1.bf16.msra.mxu0 %v3814_v54 }
 0xbb9   :  { %2804 = vmatprep.subr.bf16.mxu0 %v3515_v20 }
 0xbf5   :  { %v1099_v47 = vpop.permute.xlu1 %1098 }
 0xbf6   :  { %v1101_v51 = vmul.f32 %v2970_v46, %v1099_v47 }
 0xbf8   :  { %1103 = vrot.lane.b32.xlu1 %v1101_v51, %s3062_s29 }
 0xc6a   :  { %v1104_v29 = vpop.permute.xlu1 %1103 }
 0xc6b   :  { %v3767_v52 = vadd.f32 %v1104_v29, %v1096_v28 }
 0xc6d   :  { %2971 = vtanh.f32 %v3767_v52 }
 0xc6e   :  { %v1466_v53 = vpop.f32.mrb[10].mxu0  ;;  %2973 = vpow2.f32 %v2383_v59 }
 0xc6f   :  { %v1468_v22 = vpop.f32.mrb[11].mxu0  ;;  %v1471_v10 = vadd.f32 %v2391_v12, %v1466_v53 }
 0xc70   :  { %v1472_v21 = vadd.f32 %v2392_v15, %v1468_v22 }
 0xc71   :  { %v2394_v11 = vmul.f32 -1.442695, %v1471_v10 }
 0xc72   :  { %v2395_v30 = vmul.f32 -1.442695, %v1472_v21 }
 0xc77   :  { %v2972_v40 = vpop.eup %2971 }
 0xc78   :  { %1109 = vrot.lane.b32.xlu1 %v2972_v40, %s3062_s29  ;;  %v2974_v55 = vpop.eup %2973 }
 0xc79   :  { %v1090_v14 = vadd.f32 1.0, %v2974_v55  ;;  %v2399_v55 = vld [vmem:[%s4115_s0 + $0x68] sm:$0xff] }
 0xc7b   :  { %2975 = vrcp.f32 %v1090_v14 }
 0xc7c   :  { %2977 = vtanh.f32 %v1472_v21 }
 0xc7d   :  { %2979 = vpow2.f32 %v2394_v11 }
 0xc85   :  { %v2976_v13 = vpop.eup %2975 }
 0xc86   :  { %v2978_v20 = vpop.eup %2977 }
 0xc87   :  { %v2980_v25 = vpop.eup %2979 }
 0xc88   :  { %v1479_v33 = vadd.f32 1.0, %v2980_v25 }
 0xc8a   :  { %2981 = vrcp.f32 %v1479_v33 }
 0xc94   :  { %v2982_v45 = vpop.eup %2981 }
 0xcea   :  { %v1110_v6 = vpop.permute.xlu1 %1109 }
 0xceb   :  { %v1112_v42 = vmul.f32 %v2976_v13, %v1110_v6  ;;  %v2398_v6 = vld [vmem:[%s4115_s0 + $0x60] sm:$0xff] }
 0xced   :  { %1113 = vst.msk [vmem:[#allocation2 + $0x18] sm:$0xff] %vm57_vm0, %v1112_v42  ;;  %1240 = vrot.lane.b32.xlu1 %v1112_v42, %s3062_s29 }
 0xcf1   :  { %1488 = vrot.lane.b32.xlu1 %v2978_v20, %s3062_s29 }
 0xd5f   :  { %v1241_v34 = vpop.permute.xlu1 %1240 }
 0xd60   :  { %v1243_v37 = vsel %vm57_vm0, %v3749_v26, %v1241_v34  ;;  %v1486_v26 = vmul.f32 %v2982_v45, %v3740_v61 }
 0xd61   :  { %1341 = vmatmul.mubr.f32.vlgmr.msra.gmra.mrb[8].mxu1 %v1243_v37 }
 0xd62   :  { %2758 = vmatpush1.bf16.msra.mxu1 %v3524_v2  ;;  %1728 = vmatprep.mubr.f32.mxu1 %v3061_v3 }
 0xd63   :  { %v1489_v46 = vpop.permute.xlu1 %1488  ;;  %2760 = vmatprep.subr.bf16.mxu1 %v3536_v1 }
 0xd64   :  { %v1491_v47 = vmul.f32 %v2982_v45, %v1489_v46 }
 0xd66   :  { %1493 = vrot.lane.b32.xlu1 %v1491_v47, %s3062_s29  ;;  %2762 = vmatpush1.bf16.msra.mxu1 %v3548_v16 }
 0xd67   :  { %2764 = vmatprep.subr.bf16.mxu1 %v3551_v17 }
 0xd6a   :  { %2766 = vmatpush1.bf16.msra.mxu1 %v3566_v27 }
 0xd6b   :  { %2768 = vmatprep.subr.bf16.mxu1 %v3569_v32 }
 0xd6e   :  { %2770 = vmatpush1.bf16.msra.mxu1 %v3580_v38 }
 0xd6f   :  { %2772 = vmatprep.subr.bf16.mxu1 %v3609_v49 }
 0xdd8   :  { %v1494_v51 = vpop.permute.xlu1 %1493 }
 0xdd9   :  { %v3846_v28 = vadd.f32 %v1494_v51, %v1486_v26 }
 0xddb   :  { %2983 = vtanh.f32 %v3846_v28 }
 0xde5   :  { %v2984_v29 = vpop.eup %2983 }
 0xde6   :  { %1499 = vrot.lane.b32.xlu1 %v2984_v29, %s3062_s29 }
 0xe34   :  { %v1342_v53 = vpop.f32.mrb[8].mxu1 }
 0xe35   :  { %v1344_v22 = vpop.f32.mrb[9].mxu1 }
 0xe36   :  { %v1345_v23 = vadd.f32 %v1344_v22, %v3416_v63 }
 0xe38   :  { %2985 = vtanh.f32 %v1345_v23  ;;  %v2390_v48 = vmul.f32 -1.442695, %v1345_v23 }
 0xe39   :  { %2987 = vpow2.f32 %v2395_v30 }
 0xe42   :  { %v2986_v31 = vpop.eup %2985 }
 0xe43   :  { %1362 = vrot.lane.b32.xlu0 %v2986_v31, %s3062_s29  ;;  %v2988_v49 = vpop.eup %2987 }
 0xe44   :  { %v1480_v61 = vadd.f32 1.0, %v2988_v49 }
 0xe46   :  { %2989 = vrcp.f32 %v1480_v61 }
 0xe50   :  { %v2990_v44 = vpop.eup %2989 }
 0xe58   :  { %v1500_v36 = vpop.permute.xlu1 %1499 }
 0xe59   :  { %v1502_v9 = vmul.f32 %v2990_v44, %v1500_v36 }
 0xe5b   :  { %2400 = vmatmul.mubr.msk.f32.vlgmr.msra.gmra.mrb[10].mxu1 %vm57_vm0, %v1502_v9 }
 0xe5c   :  { %2774 = vmatpush1.bf16.msra.mxu1 %v3620_v8  ;;  %1868 = vmatprep.mubr.f32.mxu1 %v3061_v3  ;;  %v1343_v8 = vadd.f32 %v1342_v53, %v3414_v56 }
 0xe5d   :  { %2776 = vmatprep.subr.bf16.mxu1 %v3622_v60 }
 0xe5e   :  { %v2389_v60 = vmul.f32 -1.442695, %v1343_v8 }
 0xe60   :  { %2778 = vmatpush1.bf16.msra.mxu1 %v3639_v24  ;;  %2991 = vpow2.f32 %v2389_v60 }
 0xe61   :  { %2780 = vmatprep.subr.bf16.mxu1 %v3643_v5 }
 0xe64   :  { %2782 = vmatpush1.bf16.msra.mxu1 %v3660_v18 }
 0xe65   :  { %2784 = vmatprep.subr.bf16.mxu1 %v3664_v19 }
 0xe68   :  { %2786 = vmatpush1.bf16.msra.mxu1 %v3680_v35 }
 0xe69   :  { %2788 = vmatprep.subr.bf16.mxu1 %v3684_v41 }
 0xe6a   :  { %v2992_v24 = vpop.eup %2991 }
 0xe6b   :  { %v1353_v5 = vadd.f32 1.0, %v2992_v24 }
 0xe6c   :  { %2790 = vmatpush1.bf16.msra.mxu1 %v3700_v43 }
 0xe6d   :  { %2792 = vmatprep.subr.bf16.mxu1 %v3704_v50  ;;  %2993 = vrcp.f32 %v1353_v5 }
 0xe70   :  { %2794 = vmatpush1.bf16.msra.mxu1 %v3779_v0 }
 0xe71   :  { %2796 = vmatprep.subr.bf16.mxu1 %v3790_v57 }
 0xe74   :  { %2798 = vmatpush1.bf16.msra.mxu1 %v3799_v62 }
 0xe75   :  { %2800 = vmatprep.subr.bf16.mxu1 %v3803_v4 }
 0xe77   :  { %v2994_v18 = vpop.eup %2993 }
 0xe78   :  { %2802 = vmatpush1.bf16.msra.mxu1 %v3814_v54  ;;  %v1360_v41 = vmul.f32 %v2994_v18, %v3767_v52 }
 0xeb5   :  { %v1363_v19 = vpop.permute.xlu0 %1362 }
 0xeb6   :  { %v1365_v35 = vmul.f32 %v2994_v18, %v1363_v19  ;;  %v2192_v19 = vld [vmem:[%s4119_s6] sm:$0xff] }
 0xeb8   :  { %1367 = vrot.lane.b32.xlu0 %v1365_v35, %s3062_s29  ;;  %v2193_v35 = vld [vmem:[%s4119_s6 + $0x8] sm:$0xff] }
 0xf2a   :  { %v1368_v43 = vpop.permute.xlu0 %1367 }
 0xf2b   :  { %v3872_v50 = vadd.f32 %v1368_v43, %v1360_v41  ;;  %v2851_v41 = vpack.c.bf16 %v2193_v35, %v2192_v19  ;;  %v2406_v43 = vld [vmem:[%s4115_s0 + $0x78] sm:$0xff] }
 0xf2d   :  { %2995 = vtanh.f32 %v3872_v50  ;;  %2852 = vmatprep.subr.bf16.mxu1 %v2851_v41 }
 0xf2e   :  { %v1730_v39 = vpop.f32.mrb[10].mxu1  ;;  %2997 = vpow2.f32 %v2390_v48 }
 0xf2f   :  { %v1732_v58 = vpop.f32.mrb[11].mxu1  ;;  %v1735_v42 = vadd.f32 %v2398_v6, %v1730_v39 }
 0xf30   :  { %v1736_v52 = vadd.f32 %v2399_v55, %v1732_v58 }
 0xf31   :  { %v2401_v20 = vmul.f32 -1.442695, %v1735_v42 }
 0xf37   :  { %v2996_v7 = vpop.eup %2995 }
 0xf38   :  { %1373 = vrot.lane.b32.xlu0 %v2996_v7, %s3062_s29  ;;  %v2998_v40 = vpop.eup %2997 }
 0xf39   :  { %v1354_v59 = vadd.f32 1.0, %v2998_v40  ;;  %v2405_v40 = vld [vmem:[%s4115_s0 + $0x70] sm:$0xff] }
 0xf3b   :  { %2999 = vrcp.f32 %v1354_v59 }
 0xf3c   :  { %3001 = vtanh.f32 %v1736_v52 }
 0xf3d   :  { %3003 = vpow2.f32 %v2401_v20  ;;  %v2196_v20 = vld [vmem:[%s4119_s6 + $0x20] sm:$0xff] }
 0xf45   :  { %v3000_v14 = vpop.eup %2999 }
 0xf46   :  { %v3002_v13 = vpop.eup %3001 }
 0xf47   :  { %v3004_v12 = vpop.eup %3003 }
 0xf48   :  { %v1743_v10 = vadd.f32 1.0, %v3004_v12  ;;  %v2197_v12 = vld [vmem:[%s4119_s6 + $0x28] sm:$0xff] }
 0xf4a   :  { %3005 = vrcp.f32 %v1743_v10  ;;  %v2184_v10 = vld [vmem:[#allocation2] sm:$0xff] }
 0xf54   :  { %v3006_v33 = vpop.eup %3005 }
 0xfaa   :  { %v1374_v15 = vpop.permute.xlu0 %1373 }
 0xfab   :  { %v1376_v21 = vmul.f32 %v3000_v14, %v1374_v15  ;;  %v2194_v15 = vld [vmem:[%s4119_s6 + $0x10] sm:$0xff] }
 0xfad   :  { %1377 = vst.msk [vmem:[#allocation2 + $0x20] sm:$0xff] %vm57_vm0, %v1376_v21  ;;  %1504 = vrot.lane.b32.xlu0 %v1376_v21, %s3062_s29  ;;  %v2195_v21 = vld [vmem:[%s4119_s6 + $0x18] sm:$0xff] }
 0xfae   :  { %v2855_v6 = vpack.c.bf16 %v2195_v21, %v2194_v15  ;;  %v2037_v21 = vld [vmem:[%s4117_s4 + $0x8] sm:$0xff] }
 0xfb1   :  { %1752 = vrot.lane.b32.xlu0 %v3002_v13, %s3062_s29 }
0x101f   :  { %v1505_v11 = vpop.permute.xlu0 %1504 }
0x1020   :  { %v1507_v25 = vsel %vm57_vm0, %v1502_v9, %v1505_v11 }
0x1021   :  { %1605 = vmatmul.mubr.f32.vlgmr.msra.gmra.mrb[12].mxu0 %v1507_v25 }
0x1022   :  { %2806 = vmatpush1.bf16.msra.mxu0 %v3524_v2  ;;  %1992 = vmatprep.mubr.f32.mxu0 %v3061_v3  ;;  %v1750_v2 = vmul.f32 %v3006_v33, %v3846_v28 }
0x1023   :  { %v1753_v34 = vpop.permute.xlu0 %1752  ;;  %2808 = vmatprep.subr.bf16.mxu0 %v3536_v1 }
0x1024   :  { %v1755_v37 = vmul.f32 %v3006_v33, %v1753_v34  ;;  %v2859_v33 = vpack.c.bf16 %v2197_v12, %v2196_v20  ;;  %v2041_v20 = vld [vmem:[%s4117_s4 + $0x28] sm:$0xff]  ;;  %v2043_v12 = vld [vmem:[%s4117_s4 + $0x38] sm:$0xff] }
0x1026   :  { %1757 = vrot.lane.b32.xlu0 %v1755_v37, %s3062_s29  ;;  %2810 = vmatpush1.bf16.msra.mxu0 %v3548_v16  ;;  %v2198_v37 = vld [vmem:[%s4119_s6 + $0x30] sm:$0xff] }
0x1027   :  { %2812 = vmatprep.subr.bf16.mxu0 %v3551_v17 }
0x102a   :  { %2814 = vmatpush1.bf16.msra.mxu0 %v3566_v27  ;;  %v2402_v27 = vmul.f32 -1.442695, %v1736_v52 }
0x102b   :  { %2816 = vmatprep.subr.bf16.mxu0 %v3569_v32 }
0x102e   :  { %2818 = vmatpush1.bf16.msra.mxu0 %v3580_v38 }
0x1098   :  { %v1758_v45 = vpop.permute.xlu0 %1757 }
0x1099   :  { %v3896_v46 = vadd.f32 %v1758_v45, %v1750_v2  ;;  %v2199_v2 = vld [vmem:[%s4119_s6 + $0x38] sm:$0xff] }
0x109a   :  { %v2863_v45 = vpack.c.bf16 %v2199_v2, %v2198_v37  ;;  %v2045_v37 = vld [vmem:[%s4117_s4 + $0x48] sm:$0xff]  ;;  %v2047_v2 = vld [vmem:[%s4117_s4 + $0x58] sm:$0xff] }
0x109b   :  { %3007 = vtanh.f32 %v3896_v46 }
0x10a5   :  { %v3008_v1 = vpop.eup %3007 }
0x10a6   :  { %1763 = vrot.lane.b32.xlu0 %v3008_v1, %s3062_s29  ;;  %v2185_v1 = vld [vmem:[#allocation2 + $0x8] sm:$0xff] }
0x10f4   :  { %v1606_v47 = vpop.f32.mrb[12].mxu0 }
0x10f5   :  { %v1608_v16 = vpop.f32.mrb[13].mxu0  ;;  %v1607_v53 = vadd.f32 %v1606_v47, %v3414_v56  ;;  %v2186_v47 = vld [vmem:[#allocation2 + $0x10] sm:$0xff] }
0x10f6   :  { %v1609_v17 = vadd.f32 %v1608_v16, %v3416_v63  ;;  %v2187_v16 = vld [vmem:[#allocation2 + $0x18] sm:$0xff] }
0x10f7   :  { %v2396_v22 = vmul.f32 -1.442695, %v1607_v53 }
0x10f8   :  { %3009 = vtanh.f32 %v1609_v17  ;;  %v2397_v24 = vmul.f32 -1.442695, %v1609_v17  ;;  %v2188_v17 = vld [vmem:[#allocation2 + $0x20] sm:$0xff] }
0x10f9   :  { %3011 = vpow2.f32 %v2402_v27 }
0x1102   :  { %v3010_v32 = vpop.eup %3009 }
0x1103   :  { %1626 = vrot.lane.b32.xlu1 %v3010_v32, %s3062_s29  ;;  %v3012_v38 = vpop.eup %3011 }
0x1104   :  { %v1744_v26 = vadd.f32 1.0, %v3012_v38 }
0x1106   :  { %3013 = vrcp.f32 %v1744_v26 }
0x1107   :  { %3015 = vpow2.f32 %v2396_v22 }
0x1110   :  { %v3014_v51 = vpop.eup %3013 }
0x1111   :  { %v3016_v23 = vpop.eup %3015 }
0x1112   :  { %v1617_v30 = vadd.f32 1.0, %v3016_v23 }
0x1114   :  { %3017 = vrcp.f32 %v1617_v30 }
0x1118   :  { %v1764_v28 = vpop.permute.xlu0 %1763 }
0x1119   :  { %v1766_v29 = vmul.f32 %v3014_v51, %v1764_v28 }
0x111b   :  { %2407 = vmatmul.mubr.msk.f32.vlgmr.msra.gmra.mrb[14].mxu0 %vm57_vm0, %v1766_v29 }
0x111c   :  { %2132 = vmatprep.mubr.f32.mxu0 %v3061_v3 }
0x111e   :  { %v3018_v31 = vpop.eup %3017 }
0x111f   :  { %v1624_v44 = vmul.f32 %v3018_v31, %v3872_v50 }
0x1175   :  { %v1627_v49 = vpop.permute.xlu1 %1626 }
0x1176   :  { %v1629_v61 = vmul.f32 %v3018_v31, %v1627_v49 }
0x1178   :  { %1631 = vrot.lane.b32.xlu1 %v1629_v61, %s3062_s29 }
0x11ea   :  { %v1632_v36 = vpop.permute.xlu1 %1631 }
0x11eb   :  { %v3907_v9 = vadd.f32 %v1632_v36, %v1624_v44 }
0x11ed   :  { %3019 = vtanh.f32 %v3907_v9 }
0x11ee   :  { %v1994_v3 = vpop.f32.mrb[14].mxu0  ;;  %3021 = vpow2.f32 %v2397_v24 }
0x11ef   :  { %v1996_v8 = vpop.f32.mrb[15].mxu0  ;;  %v1999_v59 = vadd.f32 %v2405_v40, %v1994_v3 }
0x11f0   :  { %v2000_v50 = vadd.f32 %v2406_v43, %v1996_v8 }
0x11f1   :  { %v2408_v55 = vmul.f32 -1.442695, %v1999_v59 }
0x11f2   :  { %v2409_v22 = vmul.f32 -1.442695, %v2000_v50 }
0x11f7   :  { %v3020_v60 = vpop.eup %3019 }
0x11f8   :  { %1637 = vrot.lane.b32.xlu1 %v3020_v60, %s3062_s29  ;;  %v3022_v5 = vpop.eup %3021 }
0x11f9   :  { %v1618_v18 = vadd.f32 1.0, %v3022_v5 }
0x11fb   :  { %3023 = vrcp.f32 %v1618_v18 }
0x11fc   :  { %3025 = vtanh.f32 %v2000_v50 }
0x11fd   :  { %3027 = vpow2.f32 %v2408_v55 }
0x1205   :  { %v3024_v39 = vpop.eup %3023 }
0x1206   :  { %v3026_v48 = vpop.eup %3025 }
0x1207   :  { %v3028_v52 = vpop.eup %3027 }
0x1208   :  { %v2007_v14 = vadd.f32 1.0, %v3028_v52 }
0x120a   :  { %3029 = vrcp.f32 %v2007_v14 }
0x1214   :  { %v3030_v11 = vpop.eup %3029 }
0x1215   :  { %v2014_v32 = vmul.f32 %v3030_v11, %v3896_v46  ;;  %v3964_v46 = vld [vmem:[%s4120_s7] ss:$0 sm:$0xff] }
0x126a   :  { %v1638_v58 = vpop.permute.xlu1 %1637 }
0x126b   :  { %v1640_v7 = vmul.f32 %v3024_v39, %v1638_v58 }
0x126d   :  { %1641 = vst.msk [vmem:[#allocation2 + $0x28] sm:$0xff] %vm57_vm0, %v1640_v7  ;;  %1768 = vrot.lane.b32.xlu1 %v1640_v7, %s3062_s29 }
0x1271   :  { %2016 = vrot.lane.b32.xlu1 %v3026_v48, %s3062_s29 }
0x1274   :  { %v2189_v27 = vld [vmem:[#allocation2 + $0x28] sm:$0xff] }
0x12df   :  { %v1769_v13 = vpop.permute.xlu1 %1768 }
0x12e0   :  { %v1771_v42 = vsel %vm57_vm0, %v1766_v29, %v1769_v13  ;;  %v2039_v13 = vld [vmem:[%s4117_s4 + $0x18] sm:$0xff] }
0x12e1   :  { %1869 = vmatmul.mubr.f32.vlgmr.msra.gmra.mrb[12].mxu1 %v1771_v42  ;;  %v2819_v42 = vpack.c.bf16 %v2039_v13, %v2037_v21 }
0x12e2   :  { %2854 = vmatpush3.bf16.msra.mxu1 %v2851_v41  ;;  %2455 = vmatprep.mubr.msk.f32.mxu1 %vm57_vm0, %v2184_v10 }
0x12e3   :  { %v2017_v25 = vpop.permute.xlu1 %2016  ;;  %2856 = vmatprep.subr.bf16.mxu1 %v2855_v6  ;;  %2820 = vmatprep.subr.bf16.mxu0 %v2819_v42 }
0x12e4   :  { %v2019_v34 = vmul.f32 %v3030_v11, %v2017_v25  ;;  %v2823_v25 = vpack.c.bf16 %v2043_v12, %v2041_v20 }
0x12e6   :  { %2858 = vmatpush3.bf16.msra.mxu1 %v2855_v6  ;;  %2021 = vrot.lane.b32.xlu1 %v2019_v34, %s3062_s29  ;;  %v2036_v6 = vld [vmem:[%s4117_s4] sm:$0xff]  ;;  %v2042_v34 = vld [vmem:[%s4117_s4 + $0x30] sm:$0xff] }
0x12e7   :  { %2860 = vmatprep.subr.bf16.mxu1 %v2859_v33 }
0x12ea   :  { %2862 = vmatpush3.bf16.msra.mxu1 %v2859_v33  ;;  %v2040_v33 = vld [vmem:[%s4117_s4 + $0x20] sm:$0xff] }
0x12eb   :  { %2864 = vmatprep.subr.bf16.mxu1 %v2863_v45 }
0x12ee   :  { %2866 = vmatpush3.bf16.msra.mxu1 %v2863_v45  ;;  %v2825_v45 = vpack.c.bf16 %v2042_v34, %v2040_v33 }
0x12f1   :  { %2456 = vmatmul.mubr.msk.f32.vlgmr.msra.gmra.mrb[14].mxu1 %vm57_vm0, %v2185_v1  ;;  %v2827_v1 = vpack.c.bf16 %v2047_v2, %v2045_v37 }
0x12f2   :  { %2458 = vmatprep.mubr.msk.f32.mxu1 %vm57_vm0, %v2186_v47  ;;  %v2044_v47 = vld [vmem:[%s4117_s4 + $0x40] sm:$0xff] }
0x12f5   :  { %2459 = vmatmul.mubr.msk.f32.gmra.mrb[16].mxu1 %vm57_vm0, %v2187_v16  ;;  %v2046_v16 = vld [vmem:[%s4117_s4 + $0x50] sm:$0xff] }
0x12f6   :  { %2461 = vmatprep.mubr.msk.f32.mxu1 %vm57_vm0, %v2188_v17  ;;  %v2049_v17 = vld [vmem:[%s4117_s4 + $0x68] sm:$0xff] }
0x12f9   :  { %2462 = vmatmul.mubr.msk.f32.gmra.mrb[18].mxu1 %vm57_vm0, %v2189_v27  ;;  %v2051_v27 = vld [vmem:[%s4117_s4 + $0x78] sm:$0xff] }
0x1358   :  { %v2022_v38 = vpop.permute.xlu1 %2021 }
0x1359   :  { %v3953_v26 = vadd.f32 %v2022_v38, %v2014_v32  ;;  %v2829_v32 = vpack.c.bf16 %v2046_v16, %v2044_v47  ;;  %v2831_v38 = vpack.c.bf16 %v2051_v27, %v2049_v17 }
0x135b   :  { %3031 = vtanh.f32 %v3953_v26 }
0x1365   :  { %v3032_v51 = vpop.eup %3031 }
0x1366   :  { %2027 = vrot.lane.b32.xlu1 %v3032_v51, %s3062_s29  ;;  %v2048_v51 = vld [vmem:[%s4117_s4 + $0x60] sm:$0xff] }
0x13b4   :  { %v1870_v28 = vpop.f32.mrb[12].mxu1 }
0x13b5   :  { %v1872_v29 = vpop.f32.mrb[13].mxu1  ;;  %v1871_v39 = vadd.f32 %v1870_v28, %v3414_v56  ;;  %v2050_v28 = vld [vmem:[%s4117_s4 + $0x70] sm:$0xff] }
0x13b6   :  { %v3958_v53 = vadd.f32 %v1872_v29, %v3416_v63  ;;  %v2053_v29 = vld [vmem:[%s4117_s4 + $0x88] sm:$0xff] }
0x13b7   :  { %v2403_v58 = vmul.f32 -1.442695, %v1871_v39 }
0x13b8   :  { %3033 = vtanh.f32 %v3958_v53 }
0x13b9   :  { %3035 = vpow2.f32 %v2409_v22  ;;  %v2055_v22 = vld [vmem:[%s4117_s4 + $0x98] sm:$0xff] }
0x13c2   :  { %v3034_v23 = vpop.eup %3033 }
0x13c3   :  { %1890 = vrot.lane.b32.xlu0 %v3034_v23, %s3062_s29  ;;  %v3036_v44 = vpop.eup %3035  ;;  %v2833_v23 = vpack.c.bf16 %v2050_v28, %v2048_v51 }
0x13c4   :  { %v2457_v30 = vpop.f32.mrb[14].mxu1  ;;  %v2008_v60 = vadd.f32 1.0, %v3036_v44  ;;  %v2059_v44 = vld [vmem:[%s4117_s4 + $0xb8] sm:$0xff] }
0x13c5   :  { %v2303_v31 = vadd.f32 %v2457_v30, %v3964_v46  ;;  %v2297_v49 = vpop.f32.mrb[15].mxu1  ;;  %v2835_v30 = vpack.c.bf16 %v2055_v22, %v2053_v29 }
0x13c6   :  { %v2298_v61 = vadd.f32 %v3964_v46, %v2297_v49  ;;  %3037 = vrcp.f32 %v2008_v60  ;;  %v2054_v49 = vld [vmem:[%s4117_s4 + $0x90] sm:$0xff] }
0x13c7   :  { %2337 = vst [vmem:[%s4121_s8 + $0x8] sm:$0xff] %v2303_v31  ;;  %3039 = vpow2.f32 %v2403_v58  ;;  %v2052_v31 = vld [vmem:[%s4117_s4 + $0x80] sm:$0xff] }
0x13c8   :  { %2336 = vst [vmem:[%s4121_s8] sm:$0xff] %v2298_v61  ;;  %v2460_v36 = vpop.f32.mrb[16].mxu1  ;;  %v2057_v61 = vld [vmem:[%s4117_s4 + $0xa8] sm:$0xff] }
0x13c9   :  { %v2313_v3 = vadd.f32 %v2460_v36, %v3964_v46  ;;  %v2307_v8 = vpop.f32.mrb[17].mxu1  ;;  %v2837_v36 = vpack.c.bf16 %v2054_v49, %v2052_v31 }
0x13ca   :  { %v2308_v24 = vadd.f32 %v3964_v46, %v2307_v8  ;;  %v2404_v8 = vmul.f32 -1.442695, %v3958_v53 }
0x13cb   :  { %2339 = vst [vmem:[%s4121_s8 + $0x18] sm:$0xff] %v2313_v3  ;;  %v2839_v3 = vpack.c.bf16 %v2059_v44, %v2057_v61 }
0x13cc   :  { %2338 = vst [vmem:[%s4121_s8 + $0x10] sm:$0xff] %v2308_v24  ;;  %v2463_v5 = vpop.f32.mrb[18].mxu1 }
0x13cd   :  { %v2323_v18 = vadd.f32 %v2463_v5, %v3964_v46  ;;  %v2317_v19 = vpop.f32.mrb[19].mxu1 }
0x13ce   :  { %v2318_v35 = vadd.f32 %v3964_v46, %v2317_v19 }
0x13cf   :  { %2341 = vst [vmem:[%s4121_s8 + $0x28] sm:$0xff] %v2323_v18 }
0x13d0   :  { %2340 = vst [vmem:[%s4121_s8 + $0x20] sm:$0xff] %v2318_v35  ;;  %v3038_v41 = vpop.eup %3037 }
0x13d1   :  { %v3040_v7 = vpop.eup %3039 }
0x13d2   :  { %v1881_v48 = vadd.f32 1.0, %v3040_v7 }
0x13d4   :  { %3041 = vrcp.f32 %v1881_v48 }
0x13d8   :  { %v2028_v43 = vpop.permute.xlu1 %2027 }
0x13d9   :  { %v3991_v50 = vmul.f32 %v3038_v41, %v2028_v43 }
0x13db   :  { %2170 = vst.msk [vmem:[%s4122_s9] sm:$0xff] %vm57_vm0, %v3991_v50 }
0x13de   :  { %v3042_v40 = vpop.eup %3041 }
0x13df   :  { %v1888_v52 = vmul.f32 %v3042_v40, %v3907_v9  ;;  %v2038_v9 = vld [vmem:[%s4117_s4 + $0x10] sm:$0xff] }
0x13e0   :  { %v2821_v11 = vpack.c.bf16 %v2038_v9, %v2036_v6 }
0x13e2   :  { %2822 = vmatpush1.bf16.msra.mxu0 %v2821_v11 }
0x13e3   :  { %2824 = vmatprep.subr.bf16.mxu0 %v2823_v25 }
0x13e6   :  { %2826 = vmatpush1.bf16.msra.mxu0 %v2825_v45 }
0x13e7   :  { %2828 = vmatprep.subr.bf16.mxu0 %v2827_v1 }
0x13ea   :  { %2830 = vmatpush1.bf16.msra.mxu0 %v2829_v32 }
0x13eb   :  { %2832 = vmatprep.subr.bf16.mxu0 %v2831_v38 }
0x13ee   :  { %2834 = vmatpush1.bf16.msra.mxu0 %v2833_v23 }
0x13ef   :  { %2836 = vmatprep.subr.bf16.mxu0 %v2835_v30 }
0x13f2   :  { %2838 = vmatpush1.bf16.msra.mxu0 %v2837_v36 }
0x13f3   :  { %2840 = vmatprep.subr.bf16.mxu0 %v2839_v3 }
0x13f6   :  { %2842 = vmatpush1.bf16.msra.mxu0 %v3779_v0 }
0x13f7   :  { %2844 = vmatprep.subr.bf16.mxu0 %v3790_v57 }
0x13fa   :  { %2846 = vmatpush1.bf16.msra.mxu0 %v3799_v62 }
0x13fb   :  { %2848 = vmatprep.subr.bf16.mxu0 %v3803_v4 }
0x13fe   :  { %2850 = vmatpush1.bf16.msra.mxu0 %v3814_v54 }
0x1435   :  { %v1891_v59 = vpop.permute.xlu0 %1890 }
0x1436   :  { %v1893_v55 = vmul.f32 %v3042_v40, %v1891_v59 }
0x1438   :  { %1895 = vrot.lane.b32.xlu0 %v1893_v55, %s3062_s29 }
0x14aa   :  { %v1896_v14 = vpop.permute.xlu0 %1895 }
0x14ab   :  { %v4001_v15 = vadd.f32 %v1896_v14, %v1888_v52 }
0x14ad   :  { %3043 = vtanh.f32 %v4001_v15 }
0x14ae   :  { %3045 = vpow2.f32 %v2404_v8 }
0x14b7   :  { %v3044_v10 = vpop.eup %3043 }
0x14b8   :  { %1901 = vrot.lane.b32.xlu0 %v3044_v10, %s3062_s29  ;;  %v3046_v60 = vpop.eup %3045 }
0x14b9   :  { %v1882_v24 = vadd.f32 1.0, %v3046_v60 }
0x14bb   :  { %3047 = vrcp.f32 %v1882_v24 }
0x14c5   :  { %v3048_v5 = vpop.eup %3047 }
0x152a   :  { %v1902_v18 = vpop.permute.xlu0 %1901 }
0x152b   :  { %v1904_v19 = vmul.f32 %v3048_v5, %v1902_v18 }
0x152d   :  { %1905 = vst.msk [vmem:[#allocation2 + $0x30] sm:$0xff] %vm57_vm0, %v1904_v19  ;;  %2032 = vrot.lane.b32.xlu0 %v1904_v19, %s3062_s29 }
0x1534   :  { %v2190_v0 = vld [vmem:[#allocation2 + $0x30] sm:$0xff] }
0x1535   :  { %2464 = vmatprep.mubr.msk.f32.mxu1 %vm57_vm0, %v2190_v0 }
0x159f   :  { %v2033_v57 = vpop.permute.xlu0 %2032 }
0x15a0   :  { %v2035_v62 = vsel %vm57_vm0, %v3991_v50, %v2033_v57 }
0x15a1   :  { %2133 = vmatmul.mubr.f32.vlgmr.msra.gmra.mrb[16].mxu0 %v2035_v62 }
0x1674   :  { %v2134_v4 = vpop.f32.mrb[16].mxu0 }
0x1675   :  { %v2136_v54 = vpop.f32.mrb[17].mxu0  ;;  %v2135_v41 = vadd.f32 %v2134_v4, %v3414_v56 }
0x1676   :  { %v2137_v53 = vadd.f32 %v2136_v54, %v3416_v63 }
0x1677   :  { %v2410_v43 = vmul.f32 -1.442695, %v2135_v41 }
0x1678   :  { %3049 = vtanh.f32 %v2137_v53  ;;  %v2411_v52 = vmul.f32 -1.442695, %v2137_v53 }
0x1679   :  { %3051 = vpow2.f32 %v2410_v43 }
0x1682   :  { %v3050_v35 = vpop.eup %3049 }
0x1683   :  { %2154 = vrot.lane.b32.xlu1 %v3050_v35, %s3062_s29  ;;  %v3052_v39 = vpop.eup %3051 }
0x1684   :  { %v2145_v58 = vadd.f32 1.0, %v3052_v39 }
0x1686   :  { %3053 = vrcp.f32 %v2145_v58 }
0x1690   :  { %v3054_v7 = vpop.eup %3053 }
0x1691   :  { %v2152_v63 = vmul.f32 %v3054_v7, %v4001_v15 }
0x16f5   :  { %v2155_v48 = vpop.permute.xlu1 %2154 }
0x16f6   :  { %v2157_v40 = vmul.f32 %v3054_v7, %v2155_v48 }
0x16f8   :  { %2159 = vrot.lane.b32.xlu0 %v2157_v40, %s3062_s29 }
0x16fc   :  { %2174 = vrot.lane.b32.xlu0 %v3953_v26, %s3062_s29 }
0x176a   :  { %v2160_v50 = vpop.permute.xlu0 %2159 }
0x176b   :  { %v2162_v59 = vadd.f32 %v2160_v50, %v2152_v63 }
0x176d   :  { %3055 = vtanh.f32 %v2162_v59 }
0x176e   :  { %v2175_v55 = vpop.permute.xlu0 %2174  ;;  %3057 = vpow2.f32 %v2411_v52 }
0x176f   :  { %2177 = vst.msk [vmem:[%s4123_s10] sm:$0xff] %vm57_vm0, %v2175_v55 }
0x1777   :  { %v3056_v56 = vpop.eup %3055 }
0x1778   :  { %2165 = vrot.lane.b32.xlu1 %v3056_v56, %s3062_s29  ;;  %v3058_v14 = vpop.eup %3057 }
0x1779   :  { %v2146_v26 = vadd.f32 1.0, %v3058_v14 }
0x177b   :  { %3059 = vrcp.f32 %v2146_v26 }
0x177c   :  { %2179 = vrot.lane.b32.xlu1 %v2162_v59, %s3062_s29 }
0x1785   :  { %v3060_v15 = vpop.eup %3059 }
0x17ea   :  { %v2166_v21 = vpop.permute.xlu1 %2165 }
0x17eb   :  { %v2168_v13 = vmul.f32 %v3060_v15, %v2166_v21 }
0x17ed   :  { %2169 = vst.msk [vmem:[#allocation2 + $0x38] sm:$0xff] %vm57_vm0, %v2168_v13  ;;  %2412 = vst.msk [vmem:[%s4122_s9 + $0x8] sm:$0xff] %vm57_vm0, %v2168_v13 }
0x17ee   :  { %v2180_v6 = vpop.permute.xlu1 %2179 }
0x17ef   :  { %2413 = vst.msk [vmem:[%s4123_s10 + $0x8] sm:$0xff] %vm57_vm0, %v2180_v6 }
0x17f4   :  { %v2191_v42 = vld [vmem:[#allocation2 + $0x38] sm:$0xff] }
0x17f5   :  { %2465 = vmatmul.mubr.msk.f32.gmra.mrb[20].mxu1 %vm57_vm0, %v2191_v42 }
0x18c8   :  { %v2466_v9 = vpop.f32.mrb[20].mxu1 }
0x18c9   :  { %v2333_v20 = vadd.f32 %v2466_v9, %v3964_v46  ;;  %v2327_v12 = vpop.f32.mrb[21].mxu1 }
0x18ca   :  { %v2328_v10 = vadd.f32 %v3964_v46, %v2327_v12 }
0x18cb   :  { %2343 = vst [vmem:[%s4121_s8 + $0x38] sm:$0xff] %v2333_v20 }
0x18cc   :  { %2342 = vst [vmem:[%s4121_s8 + $0x30] sm:$0xff] %v2328_v10 }

</bundles_post_ra>
